<compile_context>
chip_gen: v7x
topology: tpu7x:2x2x1
jax: 0.10.0
libtpu: 0.0.40
codegen_flags: <defaults>
</compile_context>

<pallas_src>
import functools

import jax
import jax.numpy as jnp
from jax import lax
from jax.experimental import pallas as pl
from jax.experimental.pallas import tpu as pltpu


# ----------------------------------------------------------------------------
# Fused Pallas kernel: all LSTM layers + final FC in one invocation
# ----------------------------------------------------------------------------
def _lstm_model_kernel(num_layers, x_ref, wih0_ref, wih_ref, whh_ref, b_ref,
                       fcw_ref, fcb_ref, out_ref, gates_sc, hseq_sc):
    # x_ref   : (T, B, D)        fp32   input sequence (time-major, batch padded)
    # wih0_ref: (D, 4H)          bf16   layer-0 input weights
    # wih_ref : (max(L-1,1),H,4H)bf16   input weights for layers 1..L-1
    # whh_ref : (L, H, 4H)       bf16   recurrent weights
    # b_ref   : (L, 1, 4H)       fp32   b_ih + b_hh per layer
    # fcw_ref : (H, O)           bf16   final linear weight
    # fcb_ref : (1, O)           fp32   final linear bias
    # out_ref : (B, O)           fp32   logits
    # gates_sc: (T, B, 4H)       fp32   VMEM scratch: hoisted input projections
    # hseq_sc : (T, B, H)        fp32   VMEM scratch: inter-layer hidden sequence
    T, B, _ = x_ref.shape
    H = hseq_sc.shape[-1]

    h_last = None
    for layer in range(num_layers):
        # ---- Time-parallel input projection: one large MXU matmul over all T ----
        if layer == 0:
            inp = x_ref[...]                     # (T, B, D) fp32
            w_in = wih0_ref[...]                 # (D, 4H)   bf16
        else:
            inp = hseq_sc[...]                   # (T, B, H) fp32
            w_in = wih_ref[layer - 1]            # (H, 4H)   bf16
        d_in = inp.shape[-1]
        gx = jnp.dot(
            inp.reshape(T * B, d_in).astype(jnp.bfloat16), w_in,
            preferred_element_type=jnp.float32,
        )                                        # (T*B, 4H) fp32 accumulation
        gates_sc[...] = gx.reshape(T, B, 4 * H) + b_ref[layer]

        w_hh = whh_ref[layer]                    # (H, 4H) bf16, held resident
        write_seq = layer < (num_layers - 1)     # last layer's sequence is unused

        # ---- Sequential recurrence: only h_prev @ W_hh + gates_x[t] per step ----
        def step(t, carry, w_hh=w_hh, write_seq=write_seq):
            h, c = carry
            g = gates_sc[t] + jnp.dot(
                h.astype(jnp.bfloat16), w_hh, preferred_element_type=jnp.float32
            )                                    # (B, 4H) fp32
            i_g = jax.nn.sigmoid(g[:, 0 * H:1 * H])
            f_g = jax.nn.sigmoid(g[:, 1 * H:2 * H])
            g_g = jnp.tanh(g[:, 2 * H:3 * H])
            o_g = jax.nn.sigmoid(g[:, 3 * H:4 * H])
            c_new = f_g * c + i_g * g_g          # cell state stays fp32
            h_new = o_g * jnp.tanh(c_new)
            if write_seq:
                hseq_sc[t] = h_new
            return (h_new, c_new)

        zeros = jnp.zeros((B, H), jnp.float32)
        h_last, _ = lax.fori_loop(0, T, step, (zeros, zeros), unroll=True)

    # ---- Final FC fused in-kernel on the last timestep of the last layer ----
    out_ref[...] = (
        jnp.dot(h_last.astype(jnp.bfloat16), fcw_ref[...],
                preferred_element_type=jnp.float32)
        + fcb_ref[...]
    ).astype(out_ref.dtype)


# ----------------------------------------------------------------------------
# Wrapper
# ----------------------------------------------------------------------------
def _round_up(x, m):
    return (x + m - 1) // m * m


@jax.jit
def lstm_model_forward(x, params):
    """Equivalent of LSTMModel.forward: x (B, T, D) -> logits (B, O)."""
    B, T, D = x.shape
    L, H = params["w_hh"].shape[0], params["w_hh"].shape[1]
    O = params["fc_w"].shape[1]
    Bp = _round_up(max(B, 8), 8)                 # pad batch to sublane multiple

    x_t = jnp.transpose(x, (1, 0, 2)).astype(jnp.float32)   # time-major (T, B, D)
    if Bp != B:
        x_t = jnp.pad(x_t, ((0, 0), (0, Bp - B), (0, 0)))

    bf = jnp.bfloat16
    out = pl.pallas_call(
        functools.partial(_lstm_model_kernel, L),
        out_shape=jax.ShapeDtypeStruct((Bp, O), jnp.float32),
        grid=(),                                  # whole sequence fits VMEM: 1 step
        in_specs=[
            pl.BlockSpec((T, Bp, D), lambda: (0, 0, 0)),
            pl.BlockSpec((D, 4 * H), lambda: (0, 0)),
            pl.BlockSpec(params["w_ih"].shape, lambda: (0, 0, 0)),
            pl.BlockSpec((L, H, 4 * H), lambda: (0, 0, 0)),
            pl.BlockSpec((L, 1, 4 * H), lambda: (0, 0, 0)),
            pl.BlockSpec((H, O), lambda: (0, 0)),
            pl.BlockSpec((1, O), lambda: (0, 0)),
        ],
        out_specs=pl.BlockSpec((Bp, O), lambda: (0, 0)),
        scratch_shapes=[
            pltpu.VMEM((T, Bp, 4 * H), jnp.float32),   # hoisted gate projections
            pltpu.VMEM((T, Bp, H), jnp.float32),       # inter-layer hidden sequence
        ],
        # TODO(synk): for large H / long T, tile the 4H gate dim and chunk T, and set
        # pltpu.CompilerParams(vmem_limit_bytes=...) explicitly (v7x has 64 MiB VMEM).
    )(
        x_t,
        params["w_ih0"].astype(bf),
        params["w_ih"].astype(bf),
        params["w_hh"].astype(bf),
        params["b"],
        params["fc_w"].astype(bf),
        params["fc_b"],
    )
    return out[:B]


# ----------------------------------------------------------------------------
# Deterministic parameter init (PyTorch-style uniform(-1/sqrt(H), 1/sqrt(H)))
# ----------------------------------------------------------------------------
def init_params(key, input_size, hidden_size, num_layers, output_size):
    H = hidden_size
    bound = 1.0 / (H ** 0.5)

    def u(k, shape):
        return jax.random.uniform(k, shape, jnp.float32, -bound, bound)

    keys = jax.random.split(key, 4 * num_layers + 2)
    w_ih_list, w_hh_list, b_list = [], [], []
    for layer in range(num_layers):
        d_in = input_size if layer == 0 else H
        k1, k2, k3, k4 = keys[4 * layer:4 * layer + 4]
        w_ih_list.append(u(k1, (d_in, 4 * H)))
        w_hh_list.append(u(k2, (H, 4 * H)))
        b_list.append(u(k3, (4 * H,)) + u(k4, (4 * H,)))   # b_ih + b_hh fused

    w_ih0 = w_ih_list[0]
    if num_layers > 1:
        w_ih_rest = jnp.stack(w_ih_list[1:], axis=0)        # (L-1, H, 4H)
    else:
        w_ih_rest = jnp.zeros((1, H, 4 * H), jnp.float32)   # dummy, never read
    w_hh = jnp.stack(w_hh_list, axis=0)                     # (L, H, 4H)
    b = jnp.stack(b_list, axis=0)[:, None, :]               # (L, 1, 4H)

    fc_w = u(keys[-2], (H, output_size))
    fc_b = u(keys[-1], (1, output_size))
    return {"w_ih0": w_ih0, "w_ih": w_ih_rest, "w_hh": w_hh, "b": b,
            "fc_w": fc_w, "fc_b": fc_b}


# ----------------------------------------------------------------------------
# Pure-JAX fp32 reference (mirrors torch.nn.LSTM semantics) for validation
# ----------------------------------------------------------------------------
def reference_forward(x, params):
    B = x.shape[0]
    L, H = params["w_hh"].shape[0], params["w_hh"].shape[1]
    h_seq = jnp.transpose(x, (1, 0, 2)).astype(jnp.float32)   # (T, B, D)
    for layer in range(L):
        w_ih = params["w_ih0"] if layer == 0 else params["w_ih"][layer - 1]
        w_hh = params["w_hh"][layer]
        b = params["b"][layer]

        def step(carry, x_t, w_ih=w_ih, w_hh=w_hh, b=b):
            h, c = carry
            g = x_t @ w_ih + h @ w_hh + b
            i = jax.nn.sigmoid(g[:, 0 * H:1 * H])
            f = jax.nn.sigmoid(g[:, 1 * H:2 * H])
            gg = jnp.tanh(g[:, 2 * H:3 * H])
            o = jax.nn.sigmoid(g[:, 3 * H:4 * H])
            c = f * c + i * gg
            h = o * jnp.tanh(c)
            return (h, c), h

        init = (jnp.zeros((B, H), jnp.float32), jnp.zeros((B, H), jnp.float32))
        _, h_seq = lax.scan(step, init, h_seq)
    return h_seq[-1] @ params["fc_w"] + params["fc_b"]


# ----------------------------------------------------------------------------
if __name__ == "__main__":
    # Shapes consistent with the module's forward: x is (B, T, input_size)
    B, T = 2, 8
    input_size, hidden_size, num_layers, output_size = 16, 32, 2, 4

    key = jax.random.PRNGKey(0)
    key, kx = jax.random.split(key)
    x = jax.random.normal(kx, (B, T, input_size), dtype=jnp.float32)

    params = init_params(key, input_size, hidden_size, num_layers, output_size)

    out = jax.block_until_ready(lstm_model_forward(x, params))
    ref = reference_forward(x, params)

    assert out.shape == (B, output_size)
    # bf16 matmul operands (fp32 accumulation) vs. fp32 reference -> small drift.
    max_err = float(jnp.max(jnp.abs(out - ref)))
    assert jnp.allclose(out, ref, atol=1e-2, rtol=1e-2), (max_err, out, ref)

    print("KERNEL_OK")
</pallas_src>

<mosaic_0001>
module attributes {stable_mosaic.version = 11 : i64} {
  func.func @_lstm_model_kernel(%arg0: memref<8x8x16xf32, #tpu.memory_space<vmem>>, %arg1: memref<16x128xbf16, #tpu.memory_space<vmem>>, %arg2: memref<1x32x128xbf16, #tpu.memory_space<vmem>>, %arg3: memref<2x32x128xbf16, #tpu.memory_space<vmem>>, %arg4: memref<2x1x128xf32, #tpu.memory_space<vmem>>, %arg5: memref<32x4xbf16, #tpu.memory_space<vmem>>, %arg6: memref<1x4xf32, #tpu.memory_space<vmem>>, %arg7: memref<8x4xf32, #tpu.memory_space<vmem>>, %arg8: memref<8x8x128xf32, #tpu.memory_space<vmem>>, %arg9: memref<8x8x32xf32, #tpu.memory_space<vmem>>) attributes {dimension_semantics = [], scalar_prefetch = 0 : i64, scratch_operands = 2 : i64, tpu.core_type = #tpu.core_type<tc>} {
    %c0 = arith.constant 0 : index
    %c0_0 = arith.constant 0 : index
    %c0_1 = arith.constant 0 : index
    %0 = vector.load %arg0[%c0, %c0_0, %c0_1] : memref<8x8x16xf32, #tpu.memory_space<vmem>>, vector<8x8x16xf32>
    %c0_2 = arith.constant 0 : index
    %c0_3 = arith.constant 0 : index
    %1 = vector.load %arg1[%c0_2, %c0_3] : memref<16x128xbf16, #tpu.memory_space<vmem>>, vector<16x128xbf16>
    %2 = vector.shape_cast %0 : vector<8x8x16xf32> to vector<64x16xf32>
    %3 = arith.truncf %2 : vector<64x16xf32> to vector<64x16xbf16>
    %cst = arith.constant dense<0.000000e+00> : vector<64x128xf32>
    %4 = tpu.matmul %3, %1, %cst {dimension_numbers = #tpu.dot_dimension_numbers<[1], [0], [0], [1], [0, 0, 1, 1], [], []>} : vector<64x16xbf16>, vector<16x128xbf16>, vector<64x128xf32> -> vector<64x128xf32>
    %5 = vector.shape_cast %4 : vector<64x128xf32> to vector<8x8x128xf32>
    %c0_4 = arith.constant 0 : index
    %c0_5 = arith.constant 0 : index
    %c0_6 = arith.constant 0 : index
    %6 = vector.load %arg4[%c0_4, %c0_5, %c0_6] : memref<2x1x128xf32, #tpu.memory_space<vmem>>, vector<1x1x128xf32>
    %7 = vector.shape_cast %6 : vector<1x1x128xf32> to vector<1x128xf32>
    %8 = vector.shape_cast %7 : vector<1x128xf32> to vector<1x1x128xf32>
    %9 = vector.broadcast %8 : vector<1x1x128xf32> to vector<8x8x128xf32>
    %10 = arith.addf %5, %9 : vector<8x8x128xf32>
    %c0_7 = arith.constant 0 : index
    %c0_8 = arith.constant 0 : index
    %c0_9 = arith.constant 0 : index
    %11 = vector.load %arg8[%c0_7, %c0_8, %c0_9] : memref<8x8x128xf32, #tpu.memory_space<vmem>>, vector<8x8x128xf32>
    tpu.vector_store %arg8[%c0_7, %c0_8, %c0_9], %10 {strides = array<i32>} : memref<8x8x128xf32, #tpu.memory_space<vmem>>, vector<8x8x128xf32>,
    %c0_10 = arith.constant 0 : index
    %c0_11 = arith.constant 0 : index
    %c0_12 = arith.constant 0 : index
    %12 = vector.load %arg3[%c0_10, %c0_11, %c0_12] : memref<2x32x128xbf16, #tpu.memory_space<vmem>>, vector<1x32x128xbf16>
    %13 = vector.shape_cast %12 : vector<1x32x128xbf16> to vector<32x128xbf16>
    %cst_13 = arith.constant 0.000000e+00 : f32
    %14 = vector.broadcast %cst_13 : f32 to vector<8x32xf32>
    %c0_i32 = arith.constant 0 : i32
    %15 = arith.index_cast %c0_i32 : i32 to index
    %c0_14 = arith.constant 0 : index
    %c0_15 = arith.constant 0 : index
    %16 = vector.load %arg8[%15, %c0_14, %c0_15] : memref<8x8x128xf32, #tpu.memory_space<vmem>>, vector<1x8x128xf32>
    %17 = vector.shape_cast %16 : vector<1x8x128xf32> to vector<8x128xf32>
    %18 = arith.truncf %14 : vector<8x32xf32> to vector<8x32xbf16>
    %cst_16 = arith.constant dense<0.000000e+00> : vector<8x128xf32>
    %19 = tpu.matmul %18, %13, %cst_16 {dimension_numbers = #tpu.dot_dimension_numbers<[1], [0], [0], [1], [0, 0, 1, 1], [], []>} : vector<8x32xbf16>, vector<32x128xbf16>, vector<8x128xf32> -> vector<8x128xf32>
    %20 = arith.addf %17, %19 : vector<8x128xf32>
    %21 = vector.extract_strided_slice %20 {offsets = [0, 0], sizes = [8, 32], strides = [1, 1]} : vector<8x128xf32> to vector<8x32xf32>
    %22 = arith.negf %21 : vector<8x32xf32>
    %23 = math.exp %22 : vector<8x32xf32>
    %cst_17 = arith.constant 1.000000e+00 : f32
    %24 = vector.broadcast %cst_17 : f32 to vector<8x32xf32>
    %25 = arith.addf %24, %23 : vector<8x32xf32>
    %26 = arith.divf %24, %25 : vector<8x32xf32>
    %27 = vector.extract_strided_slice %20 {offsets = [0, 32], sizes = [8, 32], strides = [1, 1]} : vector<8x128xf32> to vector<8x32xf32>
    %28 = arith.negf %27 : vector<8x32xf32>
    %29 = math.exp %28 : vector<8x32xf32>
    %cst_18 = arith.constant 1.000000e+00 : f32
    %30 = vector.broadcast %cst_18 : f32 to vector<8x32xf32>
    %31 = arith.addf %30, %29 : vector<8x32xf32>
    %32 = arith.divf %30, %31 : vector<8x32xf32>
    %33 = vector.extract_strided_slice %20 {offsets = [0, 64], sizes = [8, 32], strides = [1, 1]} : vector<8x128xf32> to vector<8x32xf32>
    %34 = math.tanh %33 : vector<8x32xf32>
    %35 = vector.extract_strided_slice %20 {offsets = [0, 96], sizes = [8, 32], strides = [1, 1]} : vector<8x128xf32> to vector<8x32xf32>
    %36 = arith.negf %35 : vector<8x32xf32>
    %37 = math.exp %36 : vector<8x32xf32>
    %cst_19 = arith.constant 1.000000e+00 : f32
    %38 = vector.broadcast %cst_19 : f32 to vector<8x32xf32>
    %39 = arith.addf %38, %37 : vector<8x32xf32>
    %40 = arith.divf %38, %39 : vector<8x32xf32>
    %41 = arith.mulf %32, %14 : vector<8x32xf32>
    %42 = arith.mulf %26, %34 : vector<8x32xf32>
    %43 = arith.addf %41, %42 : vector<8x32xf32>
    %44 = math.tanh %43 : vector<8x32xf32>
    %45 = arith.mulf %40, %44 : vector<8x32xf32>
    %46 = arith.index_cast %c0_i32 : i32 to index
    %c0_20 = arith.constant 0 : index
    %c0_21 = arith.constant 0 : index
    %47 = vector.load %arg9[%46, %c0_20, %c0_21] : memref<8x8x32xf32, #tpu.memory_space<vmem>>, vector<1x8x32xf32>
    %48 = vector.shape_cast %47 : vector<1x8x32xf32> to vector<8x32xf32>
    %49 = vector.shape_cast %45 : vector<8x32xf32> to vector<1x8x32xf32>
    tpu.vector_store %arg9[%46, %c0_20, %c0_21], %49 {strides = array<i32>} : memref<8x8x32xf32, #tpu.memory_space<vmem>>, vector<1x8x32xf32>,
    %c1_i32 = arith.constant 1 : i32
    %50 = arith.index_cast %c1_i32 : i32 to index
    %c0_22 = arith.constant 0 : index
    %c0_23 = arith.constant 0 : index
    %51 = vector.load %arg8[%50, %c0_22, %c0_23] : memref<8x8x128xf32, #tpu.memory_space<vmem>>, vector<1x8x128xf32>
    %52 = vector.shape_cast %51 : vector<1x8x128xf32> to vector<8x128xf32>
    %53 = arith.truncf %45 : vector<8x32xf32> to vector<8x32xbf16>
    %cst_24 = arith.constant dense<0.000000e+00> : vector<8x128xf32>
    %54 = tpu.matmul %53, %13, %cst_24 {dimension_numbers = #tpu.dot_dimension_numbers<[1], [0], [0], [1], [0, 0, 1, 1], [], []>} : vector<8x32xbf16>, vector<32x128xbf16>, vector<8x128xf32> -> vector<8x128xf32>
    %55 = arith.addf %52, %54 : vector<8x128xf32>
    %56 = vector.extract_strided_slice %55 {offsets = [0, 0], sizes = [8, 32], strides = [1, 1]} : vector<8x128xf32> to vector<8x32xf32>
    %57 = arith.negf %56 : vector<8x32xf32>
    %58 = math.exp %57 : vector<8x32xf32>
    %cst_25 = arith.constant 1.000000e+00 : f32
    %59 = vector.broadcast %cst_25 : f32 to vector<8x32xf32>
    %60 = arith.addf %59, %58 : vector<8x32xf32>
    %61 = arith.divf %59, %60 : vector<8x32xf32>
    %62 = vector.extract_strided_slice %55 {offsets = [0, 32], sizes = [8, 32], strides = [1, 1]} : vector<8x128xf32> to vector<8x32xf32>
    %63 = arith.negf %62 : vector<8x32xf32>
    %64 = math.exp %63 : vector<8x32xf32>
    %cst_26 = arith.constant 1.000000e+00 : f32
    %65 = vector.broadcast %cst_26 : f32 to vector<8x32xf32>
    %66 = arith.addf %65, %64 : vector<8x32xf32>
    %67 = arith.divf %65, %66 : vector<8x32xf32>
    %68 = vector.extract_strided_slice %55 {offsets = [0, 64], sizes = [8, 32], strides = [1, 1]} : vector<8x128xf32> to vector<8x32xf32>
    %69 = math.tanh %68 : vector<8x32xf32>
    %70 = vector.extract_strided_slice %55 {offsets = [0, 96], sizes = [8, 32], strides = [1, 1]} : vector<8x128xf32> to vector<8x32xf32>
    %71 = arith.negf %70 : vector<8x32xf32>
    %72 = math.exp %71 : vector<8x32xf32>
    %cst_27 = arith.constant 1.000000e+00 : f32
    %73 = vector.broadcast %cst_27 : f32 to vector<8x32xf32>
    %74 = arith.addf %73, %72 : vector<8x32xf32>
    %75 = arith.divf %73, %74 : vector<8x32xf32>
    %76 = arith.mulf %67, %43 : vector<8x32xf32>
    %77 = arith.mulf %61, %69 : vector<8x32xf32>
    %78 = arith.addf %76, %77 : vector<8x32xf32>
    %79 = math.tanh %78 : vector<8x32xf32>
    %80 = arith.mulf %75, %79 : vector<8x32xf32>
    %81 = arith.index_cast %c1_i32 : i32 to index
    %c0_28 = arith.constant 0 : index
    %c0_29 = arith.constant 0 : index
    %82 = vector.load %arg9[%81, %c0_28, %c0_29] : memref<8x8x32xf32, #tpu.memory_space<vmem>>, vector<1x8x32xf32>
    %83 = vector.shape_cast %82 : vector<1x8x32xf32> to vector<8x32xf32>
    %84 = vector.shape_cast %80 : vector<8x32xf32> to vector<1x8x32xf32>
    tpu.vector_store %arg9[%81, %c0_28, %c0_29], %84 {strides = array<i32>} : memref<8x8x32xf32, #tpu.memory_space<vmem>>, vector<1x8x32xf32>,
    %c2_i32 = arith.constant 2 : i32
    %85 = arith.index_cast %c2_i32 : i32 to index
    %c0_30 = arith.constant 0 : index
    %c0_31 = arith.constant 0 : index
    %86 = vector.load %arg8[%85, %c0_30, %c0_31] : memref<8x8x128xf32, #tpu.memory_space<vmem>>, vector<1x8x128xf32>
    %87 = vector.shape_cast %86 : vector<1x8x128xf32> to vector<8x128xf32>
    %88 = arith.truncf %80 : vector<8x32xf32> to vector<8x32xbf16>
    %cst_32 = arith.constant dense<0.000000e+00> : vector<8x128xf32>
    %89 = tpu.matmul %88, %13, %cst_32 {dimension_numbers = #tpu.dot_dimension_numbers<[1], [0], [0], [1], [0, 0, 1, 1], [], []>} : vector<8x32xbf16>, vector<32x128xbf16>, vector<8x128xf32> -> vector<8x128xf32>
    %90 = arith.addf %87, %89 : vector<8x128xf32>
    %91 = vector.extract_strided_slice %90 {offsets = [0, 0], sizes = [8, 32], strides = [1, 1]} : vector<8x128xf32> to vector<8x32xf32>
    %92 = arith.negf %91 : vector<8x32xf32>
    %93 = math.exp %92 : vector<8x32xf32>
    %cst_33 = arith.constant 1.000000e+00 : f32
    %94 = vector.broadcast %cst_33 : f32 to vector<8x32xf32>
    %95 = arith.addf %94, %93 : vector<8x32xf32>
    %96 = arith.divf %94, %95 : vector<8x32xf32>
    %97 = vector.extract_strided_slice %90 {offsets = [0, 32], sizes = [8, 32], strides = [1, 1]} : vector<8x128xf32> to vector<8x32xf32>
    %98 = arith.negf %97 : vector<8x32xf32>
    %99 = math.exp %98 : vector<8x32xf32>
    %cst_34 = arith.constant 1.000000e+00 : f32
    %100 = vector.broadcast %cst_34 : f32 to vector<8x32xf32>
    %101 = arith.addf %100, %99 : vector<8x32xf32>
    %102 = arith.divf %100, %101 : vector<8x32xf32>
    %103 = vector.extract_strided_slice %90 {offsets = [0, 64], sizes = [8, 32], strides = [1, 1]} : vector<8x128xf32> to vector<8x32xf32>
    %104 = math.tanh %103 : vector<8x32xf32>
    %105 = vector.extract_strided_slice %90 {offsets = [0, 96], sizes = [8, 32], strides = [1, 1]} : vector<8x128xf32> to vector<8x32xf32>
    %106 = arith.negf %105 : vector<8x32xf32>
    %107 = math.exp %106 : vector<8x32xf32>
    %cst_35 = arith.constant 1.000000e+00 : f32
    %108 = vector.broadcast %cst_35 : f32 to vector<8x32xf32>
    %109 = arith.addf %108, %107 : vector<8x32xf32>
    %110 = arith.divf %108, %109 : vector<8x32xf32>
    %111 = arith.mulf %102, %78 : vector<8x32xf32>
    %112 = arith.mulf %96, %104 : vector<8x32xf32>
    %113 = arith.addf %111, %112 : vector<8x32xf32>
    %114 = math.tanh %113 : vector<8x32xf32>
    %115 = arith.mulf %110, %114 : vector<8x32xf32>
    %116 = arith.index_cast %c2_i32 : i32 to index
    %c0_36 = arith.constant 0 : index
    %c0_37 = arith.constant 0 : index
    %117 = vector.load %arg9[%116, %c0_36, %c0_37] : memref<8x8x32xf32, #tpu.memory_space<vmem>>, vector<1x8x32xf32>
    %118 = vector.shape_cast %117 : vector<1x8x32xf32> to vector<8x32xf32>
    %119 = vector.shape_cast %115 : vector<8x32xf32> to vector<1x8x32xf32>
    tpu.vector_store %arg9[%116, %c0_36, %c0_37], %119 {strides = array<i32>} : memref<8x8x32xf32, #tpu.memory_space<vmem>>, vector<1x8x32xf32>,
    %c3_i32 = arith.constant 3 : i32
    %120 = arith.index_cast %c3_i32 : i32 to index
    %c0_38 = arith.constant 0 : index
    %c0_39 = arith.constant 0 : index
    %121 = vector.load %arg8[%120, %c0_38, %c0_39] : memref<8x8x128xf32, #tpu.memory_space<vmem>>, vector<1x8x128xf32>
    %122 = vector.shape_cast %121 : vector<1x8x128xf32> to vector<8x128xf32>
    %123 = arith.truncf %115 : vector<8x32xf32> to vector<8x32xbf16>
    %cst_40 = arith.constant dense<0.000000e+00> : vector<8x128xf32>
    %124 = tpu.matmul %123, %13, %cst_40 {dimension_numbers = #tpu.dot_dimension_numbers<[1], [0], [0], [1], [0, 0, 1, 1], [], []>} : vector<8x32xbf16>, vector<32x128xbf16>, vector<8x128xf32> -> vector<8x128xf32>
    %125 = arith.addf %122, %124 : vector<8x128xf32>
    %126 = vector.extract_strided_slice %125 {offsets = [0, 0], sizes = [8, 32], strides = [1, 1]} : vector<8x128xf32> to vector<8x32xf32>
    %127 = arith.negf %126 : vector<8x32xf32>
    %128 = math.exp %127 : vector<8x32xf32>
    %cst_41 = arith.constant 1.000000e+00 : f32
    %129 = vector.broadcast %cst_41 : f32 to vector<8x32xf32>
    %130 = arith.addf %129, %128 : vector<8x32xf32>
    %131 = arith.divf %129, %130 : vector<8x32xf32>
    %132 = vector.extract_strided_slice %125 {offsets = [0, 32], sizes = [8, 32], strides = [1, 1]} : vector<8x128xf32> to vector<8x32xf32>
    %133 = arith.negf %132 : vector<8x32xf32>
    %134 = math.exp %133 : vector<8x32xf32>
    %cst_42 = arith.constant 1.000000e+00 : f32
    %135 = vector.broadcast %cst_42 : f32 to vector<8x32xf32>
    %136 = arith.addf %135, %134 : vector<8x32xf32>
    %137 = arith.divf %135, %136 : vector<8x32xf32>
    %138 = vector.extract_strided_slice %125 {offsets = [0, 64], sizes = [8, 32], strides = [1, 1]} : vector<8x128xf32> to vector<8x32xf32>
    %139 = math.tanh %138 : vector<8x32xf32>
    %140 = vector.extract_strided_slice %125 {offsets = [0, 96], sizes = [8, 32], strides = [1, 1]} : vector<8x128xf32> to vector<8x32xf32>
    %141 = arith.negf %140 : vector<8x32xf32>
    %142 = math.exp %141 : vector<8x32xf32>
    %cst_43 = arith.constant 1.000000e+00 : f32
    %143 = vector.broadcast %cst_43 : f32 to vector<8x32xf32>
    %144 = arith.addf %143, %142 : vector<8x32xf32>
    %145 = arith.divf %143, %144 : vector<8x32xf32>
    %146 = arith.mulf %137, %113 : vector<8x32xf32>
    %147 = arith.mulf %131, %139 : vector<8x32xf32>
    %148 = arith.addf %146, %147 : vector<8x32xf32>
    %149 = math.tanh %148 : vector<8x32xf32>
    %150 = arith.mulf %145, %149 : vector<8x32xf32>
    %151 = arith.index_cast %c3_i32 : i32 to index
    %c0_44 = arith.constant 0 : index
    %c0_45 = arith.constant 0 : index
    %152 = vector.load %arg9[%151, %c0_44, %c0_45] : memref<8x8x32xf32, #tpu.memory_space<vmem>>, vector<1x8x32xf32>
    %153 = vector.shape_cast %152 : vector<1x8x32xf32> to vector<8x32xf32>
    %154 = vector.shape_cast %150 : vector<8x32xf32> to vector<1x8x32xf32>
    tpu.vector_store %arg9[%151, %c0_44, %c0_45], %154 {strides = array<i32>} : memref<8x8x32xf32, #tpu.memory_space<vmem>>, vector<1x8x32xf32>,
    %c4_i32 = arith.constant 4 : i32
    %155 = arith.index_cast %c4_i32 : i32 to index
    %c0_46 = arith.constant 0 : index
    %c0_47 = arith.constant 0 : index
    %156 = vector.load %arg8[%155, %c0_46, %c0_47] : memref<8x8x128xf32, #tpu.memory_space<vmem>>, vector<1x8x128xf32>
    %157 = vector.shape_cast %156 : vector<1x8x128xf32> to vector<8x128xf32>
    %158 = arith.truncf %150 : vector<8x32xf32> to vector<8x32xbf16>
    %cst_48 = arith.constant dense<0.000000e+00> : vector<8x128xf32>
    %159 = tpu.matmul %158, %13, %cst_48 {dimension_numbers = #tpu.dot_dimension_numbers<[1], [0], [0], [1], [0, 0, 1, 1], [], []>} : vector<8x32xbf16>, vector<32x128xbf16>, vector<8x128xf32> -> vector<8x128xf32>
    %160 = arith.addf %157, %159 : vector<8x128xf32>
    %161 = vector.extract_strided_slice %160 {offsets = [0, 0], sizes = [8, 32], strides = [1, 1]} : vector<8x128xf32> to vector<8x32xf32>
    %162 = arith.negf %161 : vector<8x32xf32>
    %163 = math.exp %162 : vector<8x32xf32>
    %cst_49 = arith.constant 1.000000e+00 : f32
    %164 = vector.broadcast %cst_49 : f32 to vector<8x32xf32>
    %165 = arith.addf %164, %163 : vector<8x32xf32>
    %166 = arith.divf %164, %165 : vector<8x32xf32>
    %167 = vector.extract_strided_slice %160 {offsets = [0, 32], sizes = [8, 32], strides = [1, 1]} : vector<8x128xf32> to vector<8x32xf32>
    %168 = arith.negf %167 : vector<8x32xf32>
    %169 = math.exp %168 : vector<8x32xf32>
    %cst_50 = arith.constant 1.000000e+00 : f32
    %170 = vector.broadcast %cst_50 : f32 to vector<8x32xf32>
    %171 = arith.addf %170, %169 : vector<8x32xf32>
    %172 = arith.divf %170, %171 : vector<8x32xf32>
    %173 = vector.extract_strided_slice %160 {offsets = [0, 64], sizes = [8, 32], strides = [1, 1]} : vector<8x128xf32> to vector<8x32xf32>
    %174 = math.tanh %173 : vector<8x32xf32>
    %175 = vector.extract_strided_slice %160 {offsets = [0, 96], sizes = [8, 32], strides = [1, 1]} : vector<8x128xf32> to vector<8x32xf32>
    %176 = arith.negf %175 : vector<8x32xf32>
    %177 = math.exp %176 : vector<8x32xf32>
    %cst_51 = arith.constant 1.000000e+00 : f32
    %178 = vector.broadcast %cst_51 : f32 to vector<8x32xf32>
    %179 = arith.addf %178, %177 : vector<8x32xf32>
    %180 = arith.divf %178, %179 : vector<8x32xf32>
    %181 = arith.mulf %172, %148 : vector<8x32xf32>
    %182 = arith.mulf %166, %174 : vector<8x32xf32>
    %183 = arith.addf %181, %182 : vector<8x32xf32>
    %184 = math.tanh %183 : vector<8x32xf32>
    %185 = arith.mulf %180, %184 : vector<8x32xf32>
    %186 = arith.index_cast %c4_i32 : i32 to index
    %c0_52 = arith.constant 0 : index
    %c0_53 = arith.constant 0 : index
    %187 = vector.load %arg9[%186, %c0_52, %c0_53] : memref<8x8x32xf32, #tpu.memory_space<vmem>>, vector<1x8x32xf32>
    %188 = vector.shape_cast %187 : vector<1x8x32xf32> to vector<8x32xf32>
    %189 = vector.shape_cast %185 : vector<8x32xf32> to vector<1x8x32xf32>
    tpu.vector_store %arg9[%186, %c0_52, %c0_53], %189 {strides = array<i32>} : memref<8x8x32xf32, #tpu.memory_space<vmem>>, vector<1x8x32xf32>,
    %c5_i32 = arith.constant 5 : i32
    %190 = arith.index_cast %c5_i32 : i32 to index
    %c0_54 = arith.constant 0 : index
    %c0_55 = arith.constant 0 : index
    %191 = vector.load %arg8[%190, %c0_54, %c0_55] : memref<8x8x128xf32, #tpu.memory_space<vmem>>, vector<1x8x128xf32>
    %192 = vector.shape_cast %191 : vector<1x8x128xf32> to vector<8x128xf32>
    %193 = arith.truncf %185 : vector<8x32xf32> to vector<8x32xbf16>
    %cst_56 = arith.constant dense<0.000000e+00> : vector<8x128xf32>
    %194 = tpu.matmul %193, %13, %cst_56 {dimension_numbers = #tpu.dot_dimension_numbers<[1], [0], [0], [1], [0, 0, 1, 1], [], []>} : vector<8x32xbf16>, vector<32x128xbf16>, vector<8x128xf32> -> vector<8x128xf32>
    %195 = arith.addf %192, %194 : vector<8x128xf32>
    %196 = vector.extract_strided_slice %195 {offsets = [0, 0], sizes = [8, 32], strides = [1, 1]} : vector<8x128xf32> to vector<8x32xf32>
    %197 = arith.negf %196 : vector<8x32xf32>
    %198 = math.exp %197 : vector<8x32xf32>
    %cst_57 = arith.constant 1.000000e+00 : f32
    %199 = vector.broadcast %cst_57 : f32 to vector<8x32xf32>
    %200 = arith.addf %199, %198 : vector<8x32xf32>
    %201 = arith.divf %199, %200 : vector<8x32xf32>
    %202 = vector.extract_strided_slice %195 {offsets = [0, 32], sizes = [8, 32], strides = [1, 1]} : vector<8x128xf32> to vector<8x32xf32>
    %203 = arith.negf %202 : vector<8x32xf32>
    %204 = math.exp %203 : vector<8x32xf32>
    %cst_58 = arith.constant 1.000000e+00 : f32
    %205 = vector.broadcast %cst_58 : f32 to vector<8x32xf32>
    %206 = arith.addf %205, %204 : vector<8x32xf32>
    %207 = arith.divf %205, %206 : vector<8x32xf32>
    %208 = vector.extract_strided_slice %195 {offsets = [0, 64], sizes = [8, 32], strides = [1, 1]} : vector<8x128xf32> to vector<8x32xf32>
    %209 = math.tanh %208 : vector<8x32xf32>
    %210 = vector.extract_strided_slice %195 {offsets = [0, 96], sizes = [8, 32], strides = [1, 1]} : vector<8x128xf32> to vector<8x32xf32>
    %211 = arith.negf %210 : vector<8x32xf32>
    %212 = math.exp %211 : vector<8x32xf32>
    %cst_59 = arith.constant 1.000000e+00 : f32
    %213 = vector.broadcast %cst_59 : f32 to vector<8x32xf32>
    %214 = arith.addf %213, %212 : vector<8x32xf32>
    %215 = arith.divf %213, %214 : vector<8x32xf32>
    %216 = arith.mulf %207, %183 : vector<8x32xf32>
    %217 = arith.mulf %201, %209 : vector<8x32xf32>
    %218 = arith.addf %216, %217 : vector<8x32xf32>
    %219 = math.tanh %218 : vector<8x32xf32>
    %220 = arith.mulf %215, %219 : vector<8x32xf32>
    %221 = arith.index_cast %c5_i32 : i32 to index
    %c0_60 = arith.constant 0 : index
    %c0_61 = arith.constant 0 : index
    %222 = vector.load %arg9[%221, %c0_60, %c0_61] : memref<8x8x32xf32, #tpu.memory_space<vmem>>, vector<1x8x32xf32>
    %223 = vector.shape_cast %222 : vector<1x8x32xf32> to vector<8x32xf32>
    %224 = vector.shape_cast %220 : vector<8x32xf32> to vector<1x8x32xf32>
    tpu.vector_store %arg9[%221, %c0_60, %c0_61], %224 {strides = array<i32>} : memref<8x8x32xf32, #tpu.memory_space<vmem>>, vector<1x8x32xf32>,
    %c6_i32 = arith.constant 6 : i32
    %225 = arith.index_cast %c6_i32 : i32 to index
    %c0_62 = arith.constant 0 : index
    %c0_63 = arith.constant 0 : index
    %226 = vector.load %arg8[%225, %c0_62, %c0_63] : memref<8x8x128xf32, #tpu.memory_space<vmem>>, vector<1x8x128xf32>
    %227 = vector.shape_cast %226 : vector<1x8x128xf32> to vector<8x128xf32>
    %228 = arith.truncf %220 : vector<8x32xf32> to vector<8x32xbf16>
    %cst_64 = arith.constant dense<0.000000e+00> : vector<8x128xf32>
    %229 = tpu.matmul %228, %13, %cst_64 {dimension_numbers = #tpu.dot_dimension_numbers<[1], [0], [0], [1], [0, 0, 1, 1], [], []>} : vector<8x32xbf16>, vector<32x128xbf16>, vector<8x128xf32> -> vector<8x128xf32>
    %230 = arith.addf %227, %229 : vector<8x128xf32>
    %231 = vector.extract_strided_slice %230 {offsets = [0, 0], sizes = [8, 32], strides = [1, 1]} : vector<8x128xf32> to vector<8x32xf32>
    %232 = arith.negf %231 : vector<8x32xf32>
    %233 = math.exp %232 : vector<8x32xf32>
    %cst_65 = arith.constant 1.000000e+00 : f32
    %234 = vector.broadcast %cst_65 : f32 to vector<8x32xf32>
    %235 = arith.addf %234, %233 : vector<8x32xf32>
    %236 = arith.divf %234, %235 : vector<8x32xf32>
    %237 = vector.extract_strided_slice %230 {offsets = [0, 32], sizes = [8, 32], strides = [1, 1]} : vector<8x128xf32> to vector<8x32xf32>
    %238 = arith.negf %237 : vector<8x32xf32>
    %239 = math.exp %238 : vector<8x32xf32>
    %cst_66 = arith.constant 1.000000e+00 : f32
    %240 = vector.broadcast %cst_66 : f32 to vector<8x32xf32>
    %241 = arith.addf %240, %239 : vector<8x32xf32>
    %242 = arith.divf %240, %241 : vector<8x32xf32>
    %243 = vector.extract_strided_slice %230 {offsets = [0, 64], sizes = [8, 32], strides = [1, 1]} : vector<8x128xf32> to vector<8x32xf32>
    %244 = math.tanh %243 : vector<8x32xf32>
    %245 = vector.extract_strided_slice %230 {offsets = [0, 96], sizes = [8, 32], strides = [1, 1]} : vector<8x128xf32> to vector<8x32xf32>
    %246 = arith.negf %245 : vector<8x32xf32>
    %247 = math.exp %246 : vector<8x32xf32>
    %cst_67 = arith.constant 1.000000e+00 : f32
    %248 = vector.broadcast %cst_67 : f32 to vector<8x32xf32>
    %249 = arith.addf %248, %247 : vector<8x32xf32>
    %250 = arith.divf %248, %249 : vector<8x32xf32>
    %251 = arith.mulf %242, %218 : vector<8x32xf32>
    %252 = arith.mulf %236, %244 : vector<8x32xf32>
    %253 = arith.addf %251, %252 : vector<8x32xf32>
    %254 = math.tanh %253 : vector<8x32xf32>
    %255 = arith.mulf %250, %254 : vector<8x32xf32>
    %256 = arith.index_cast %c6_i32 : i32 to index
    %c0_68 = arith.constant 0 : index
    %c0_69 = arith.constant 0 : index
    %257 = vector.load %arg9[%256, %c0_68, %c0_69] : memref<8x8x32xf32, #tpu.memory_space<vmem>>, vector<1x8x32xf32>
    %258 = vector.shape_cast %257 : vector<1x8x32xf32> to vector<8x32xf32>
    %259 = vector.shape_cast %255 : vector<8x32xf32> to vector<1x8x32xf32>
    tpu.vector_store %arg9[%256, %c0_68, %c0_69], %259 {strides = array<i32>} : memref<8x8x32xf32, #tpu.memory_space<vmem>>, vector<1x8x32xf32>,
    %c7_i32 = arith.constant 7 : i32
    %260 = arith.index_cast %c7_i32 : i32 to index
    %c0_70 = arith.constant 0 : index
    %c0_71 = arith.constant 0 : index
    %261 = vector.load %arg8[%260, %c0_70, %c0_71] : memref<8x8x128xf32, #tpu.memory_space<vmem>>, vector<1x8x128xf32>
    %262 = vector.shape_cast %261 : vector<1x8x128xf32> to vector<8x128xf32>
    %263 = arith.truncf %255 : vector<8x32xf32> to vector<8x32xbf16>
    %cst_72 = arith.constant dense<0.000000e+00> : vector<8x128xf32>
    %264 = tpu.matmul %263, %13, %cst_72 {dimension_numbers = #tpu.dot_dimension_numbers<[1], [0], [0], [1], [0, 0, 1, 1], [], []>} : vector<8x32xbf16>, vector<32x128xbf16>, vector<8x128xf32> -> vector<8x128xf32>
    %265 = arith.addf %262, %264 : vector<8x128xf32>
    %266 = vector.extract_strided_slice %265 {offsets = [0, 0], sizes = [8, 32], strides = [1, 1]} : vector<8x128xf32> to vector<8x32xf32>
    %267 = arith.negf %266 : vector<8x32xf32>
    %268 = math.exp %267 : vector<8x32xf32>
    %cst_73 = arith.constant 1.000000e+00 : f32
    %269 = vector.broadcast %cst_73 : f32 to vector<8x32xf32>
    %270 = arith.addf %269, %268 : vector<8x32xf32>
    %271 = arith.divf %269, %270 : vector<8x32xf32>
    %272 = vector.extract_strided_slice %265 {offsets = [0, 32], sizes = [8, 32], strides = [1, 1]} : vector<8x128xf32> to vector<8x32xf32>
    %273 = arith.negf %272 : vector<8x32xf32>
    %274 = math.exp %273 : vector<8x32xf32>
    %cst_74 = arith.constant 1.000000e+00 : f32
    %275 = vector.broadcast %cst_74 : f32 to vector<8x32xf32>
    %276 = arith.addf %275, %274 : vector<8x32xf32>
    %277 = arith.divf %275, %276 : vector<8x32xf32>
    %278 = vector.extract_strided_slice %265 {offsets = [0, 64], sizes = [8, 32], strides = [1, 1]} : vector<8x128xf32> to vector<8x32xf32>
    %279 = math.tanh %278 : vector<8x32xf32>
    %280 = vector.extract_strided_slice %265 {offsets = [0, 96], sizes = [8, 32], strides = [1, 1]} : vector<8x128xf32> to vector<8x32xf32>
    %281 = arith.negf %280 : vector<8x32xf32>
    %282 = math.exp %281 : vector<8x32xf32>
    %cst_75 = arith.constant 1.000000e+00 : f32
    %283 = vector.broadcast %cst_75 : f32 to vector<8x32xf32>
    %284 = arith.addf %283, %282 : vector<8x32xf32>
    %285 = arith.divf %283, %284 : vector<8x32xf32>
    %286 = arith.mulf %277, %253 : vector<8x32xf32>
    %287 = arith.mulf %271, %279 : vector<8x32xf32>
    %288 = arith.addf %286, %287 : vector<8x32xf32>
    %289 = math.tanh %288 : vector<8x32xf32>
    %290 = arith.mulf %285, %289 : vector<8x32xf32>
    %291 = arith.index_cast %c7_i32 : i32 to index
    %c0_76 = arith.constant 0 : index
    %c0_77 = arith.constant 0 : index
    %292 = vector.load %arg9[%291, %c0_76, %c0_77] : memref<8x8x32xf32, #tpu.memory_space<vmem>>, vector<1x8x32xf32>
    %293 = vector.shape_cast %292 : vector<1x8x32xf32> to vector<8x32xf32>
    %294 = vector.shape_cast %290 : vector<8x32xf32> to vector<1x8x32xf32>
    tpu.vector_store %arg9[%291, %c0_76, %c0_77], %294 {strides = array<i32>} : memref<8x8x32xf32, #tpu.memory_space<vmem>>, vector<1x8x32xf32>,
    %c8_i32 = arith.constant 8 : i32
    %c0_78 = arith.constant 0 : index
    %c0_79 = arith.constant 0 : index
    %c0_80 = arith.constant 0 : index
    %295 = vector.load %arg9[%c0_78, %c0_79, %c0_80] : memref<8x8x32xf32, #tpu.memory_space<vmem>>, vector<8x8x32xf32>
    %c0_81 = arith.constant 0 : index
    %c0_82 = arith.constant 0 : index
    %c0_83 = arith.constant 0 : index
    %296 = vector.load %arg2[%c0_81, %c0_82, %c0_83] : memref<1x32x128xbf16, #tpu.memory_space<vmem>>, vector<1x32x128xbf16>
    %297 = vector.shape_cast %296 : vector<1x32x128xbf16> to vector<32x128xbf16>
    %298 = vector.shape_cast %295 : vector<8x8x32xf32> to vector<64x32xf32>
    %299 = arith.truncf %298 : vector<64x32xf32> to vector<64x32xbf16>
    %cst_84 = arith.constant dense<0.000000e+00> : vector<64x128xf32>
    %300 = tpu.matmul %299, %297, %cst_84 {dimension_numbers = #tpu.dot_dimension_numbers<[1], [0], [0], [1], [0, 0, 1, 1], [], []>} : vector<64x32xbf16>, vector<32x128xbf16>, vector<64x128xf32> -> vector<64x128xf32>
    %301 = vector.shape_cast %300 : vector<64x128xf32> to vector<8x8x128xf32>
    %c1 = arith.constant 1 : index
    %c0_85 = arith.constant 0 : index
    %c0_86 = arith.constant 0 : index
    %302 = vector.load %arg4[%c1, %c0_85, %c0_86] : memref<2x1x128xf32, #tpu.memory_space<vmem>>, vector<1x1x128xf32>
    %303 = vector.shape_cast %302 : vector<1x1x128xf32> to vector<1x128xf32>
    %304 = vector.shape_cast %303 : vector<1x128xf32> to vector<1x1x128xf32>
    %305 = vector.broadcast %304 : vector<1x1x128xf32> to vector<8x8x128xf32>
    %306 = arith.addf %301, %305 : vector<8x8x128xf32>
    %c0_87 = arith.constant 0 : index
    %c0_88 = arith.constant 0 : index
    %c0_89 = arith.constant 0 : index
    %307 = vector.load %arg8[%c0_87, %c0_88, %c0_89] : memref<8x8x128xf32, #tpu.memory_space<vmem>>, vector<8x8x128xf32>
    tpu.vector_store %arg8[%c0_87, %c0_88, %c0_89], %306 {strides = array<i32>} : memref<8x8x128xf32, #tpu.memory_space<vmem>>, vector<8x8x128xf32>,
    %c1_90 = arith.constant 1 : index
    %c0_91 = arith.constant 0 : index
    %c0_92 = arith.constant 0 : index
    %308 = vector.load %arg3[%c1_90, %c0_91, %c0_92] : memref<2x32x128xbf16, #tpu.memory_space<vmem>>, vector<1x32x128xbf16>
    %309 = vector.shape_cast %308 : vector<1x32x128xbf16> to vector<32x128xbf16>
    %cst_93 = arith.constant 0.000000e+00 : f32
    %310 = vector.broadcast %cst_93 : f32 to vector<8x32xf32>
    %c0_i32_94 = arith.constant 0 : i32
    %311 = arith.index_cast %c0_i32_94 : i32 to index
    %c0_95 = arith.constant 0 : index
    %c0_96 = arith.constant 0 : index
    %312 = vector.load %arg8[%311, %c0_95, %c0_96] : memref<8x8x128xf32, #tpu.memory_space<vmem>>, vector<1x8x128xf32>
    %313 = vector.shape_cast %312 : vector<1x8x128xf32> to vector<8x128xf32>
    %314 = arith.truncf %310 : vector<8x32xf32> to vector<8x32xbf16>
    %cst_97 = arith.constant dense<0.000000e+00> : vector<8x128xf32>
    %315 = tpu.matmul %314, %309, %cst_97 {dimension_numbers = #tpu.dot_dimension_numbers<[1], [0], [0], [1], [0, 0, 1, 1], [], []>} : vector<8x32xbf16>, vector<32x128xbf16>, vector<8x128xf32> -> vector<8x128xf32>
    %316 = arith.addf %313, %315 : vector<8x128xf32>
    %317 = vector.extract_strided_slice %316 {offsets = [0, 0], sizes = [8, 32], strides = [1, 1]} : vector<8x128xf32> to vector<8x32xf32>
    %318 = arith.negf %317 : vector<8x32xf32>
    %319 = math.exp %318 : vector<8x32xf32>
    %cst_98 = arith.constant 1.000000e+00 : f32
    %320 = vector.broadcast %cst_98 : f32 to vector<8x32xf32>
    %321 = arith.addf %320, %319 : vector<8x32xf32>
    %322 = arith.divf %320, %321 : vector<8x32xf32>
    %323 = vector.extract_strided_slice %316 {offsets = [0, 32], sizes = [8, 32], strides = [1, 1]} : vector<8x128xf32> to vector<8x32xf32>
    %324 = arith.negf %323 : vector<8x32xf32>
    %325 = math.exp %324 : vector<8x32xf32>
    %cst_99 = arith.constant 1.000000e+00 : f32
    %326 = vector.broadcast %cst_99 : f32 to vector<8x32xf32>
    %327 = arith.addf %326, %325 : vector<8x32xf32>
    %328 = arith.divf %326, %327 : vector<8x32xf32>
    %329 = vector.extract_strided_slice %316 {offsets = [0, 64], sizes = [8, 32], strides = [1, 1]} : vector<8x128xf32> to vector<8x32xf32>
    %330 = math.tanh %329 : vector<8x32xf32>
    %331 = vector.extract_strided_slice %316 {offsets = [0, 96], sizes = [8, 32], strides = [1, 1]} : vector<8x128xf32> to vector<8x32xf32>
    %332 = arith.negf %331 : vector<8x32xf32>
    %333 = math.exp %332 : vector<8x32xf32>
    %cst_100 = arith.constant 1.000000e+00 : f32
    %334 = vector.broadcast %cst_100 : f32 to vector<8x32xf32>
    %335 = arith.addf %334, %333 : vector<8x32xf32>
    %336 = arith.divf %334, %335 : vector<8x32xf32>
    %337 = arith.mulf %328, %310 : vector<8x32xf32>
    %338 = arith.mulf %322, %330 : vector<8x32xf32>
    %339 = arith.addf %337, %338 : vector<8x32xf32>
    %340 = math.tanh %339 : vector<8x32xf32>
    %341 = arith.mulf %336, %340 : vector<8x32xf32>
    %c1_i32_101 = arith.constant 1 : i32
    %342 = arith.index_cast %c1_i32_101 : i32 to index
    %c0_102 = arith.constant 0 : index
    %c0_103 = arith.constant 0 : index
    %343 = vector.load %arg8[%342, %c0_102, %c0_103] : memref<8x8x128xf32, #tpu.memory_space<vmem>>, vector<1x8x128xf32>
    %344 = vector.shape_cast %343 : vector<1x8x128xf32> to vector<8x128xf32>
    %345 = arith.truncf %341 : vector<8x32xf32> to vector<8x32xbf16>
    %cst_104 = arith.constant dense<0.000000e+00> : vector<8x128xf32>
    %346 = tpu.matmul %345, %309, %cst_104 {dimension_numbers = #tpu.dot_dimension_numbers<[1], [0], [0], [1], [0, 0, 1, 1], [], []>} : vector<8x32xbf16>, vector<32x128xbf16>, vector<8x128xf32> -> vector<8x128xf32>
    %347 = arith.addf %344, %346 : vector<8x128xf32>
    %348 = vector.extract_strided_slice %347 {offsets = [0, 0], sizes = [8, 32], strides = [1, 1]} : vector<8x128xf32> to vector<8x32xf32>
    %349 = arith.negf %348 : vector<8x32xf32>
    %350 = math.exp %349 : vector<8x32xf32>
    %cst_105 = arith.constant 1.000000e+00 : f32
    %351 = vector.broadcast %cst_105 : f32 to vector<8x32xf32>
    %352 = arith.addf %351, %350 : vector<8x32xf32>
    %353 = arith.divf %351, %352 : vector<8x32xf32>
    %354 = vector.extract_strided_slice %347 {offsets = [0, 32], sizes = [8, 32], strides = [1, 1]} : vector<8x128xf32> to vector<8x32xf32>
    %355 = arith.negf %354 : vector<8x32xf32>
    %356 = math.exp %355 : vector<8x32xf32>
    %cst_106 = arith.constant 1.000000e+00 : f32
    %357 = vector.broadcast %cst_106 : f32 to vector<8x32xf32>
    %358 = arith.addf %357, %356 : vector<8x32xf32>
    %359 = arith.divf %357, %358 : vector<8x32xf32>
    %360 = vector.extract_strided_slice %347 {offsets = [0, 64], sizes = [8, 32], strides = [1, 1]} : vector<8x128xf32> to vector<8x32xf32>
    %361 = math.tanh %360 : vector<8x32xf32>
    %362 = vector.extract_strided_slice %347 {offsets = [0, 96], sizes = [8, 32], strides = [1, 1]} : vector<8x128xf32> to vector<8x32xf32>
    %363 = arith.negf %362 : vector<8x32xf32>
    %364 = math.exp %363 : vector<8x32xf32>
    %cst_107 = arith.constant 1.000000e+00 : f32
    %365 = vector.broadcast %cst_107 : f32 to vector<8x32xf32>
    %366 = arith.addf %365, %364 : vector<8x32xf32>
    %367 = arith.divf %365, %366 : vector<8x32xf32>
    %368 = arith.mulf %359, %339 : vector<8x32xf32>
    %369 = arith.mulf %353, %361 : vector<8x32xf32>
    %370 = arith.addf %368, %369 : vector<8x32xf32>
    %371 = math.tanh %370 : vector<8x32xf32>
    %372 = arith.mulf %367, %371 : vector<8x32xf32>
    %c2_i32_108 = arith.constant 2 : i32
    %373 = arith.index_cast %c2_i32_108 : i32 to index
    %c0_109 = arith.constant 0 : index
    %c0_110 = arith.constant 0 : index
    %374 = vector.load %arg8[%373, %c0_109, %c0_110] : memref<8x8x128xf32, #tpu.memory_space<vmem>>, vector<1x8x128xf32>
    %375 = vector.shape_cast %374 : vector<1x8x128xf32> to vector<8x128xf32>
    %376 = arith.truncf %372 : vector<8x32xf32> to vector<8x32xbf16>
    %cst_111 = arith.constant dense<0.000000e+00> : vector<8x128xf32>
    %377 = tpu.matmul %376, %309, %cst_111 {dimension_numbers = #tpu.dot_dimension_numbers<[1], [0], [0], [1], [0, 0, 1, 1], [], []>} : vector<8x32xbf16>, vector<32x128xbf16>, vector<8x128xf32> -> vector<8x128xf32>
    %378 = arith.addf %375, %377 : vector<8x128xf32>
    %379 = vector.extract_strided_slice %378 {offsets = [0, 0], sizes = [8, 32], strides = [1, 1]} : vector<8x128xf32> to vector<8x32xf32>
    %380 = arith.negf %379 : vector<8x32xf32>
    %381 = math.exp %380 : vector<8x32xf32>
    %cst_112 = arith.constant 1.000000e+00 : f32
    %382 = vector.broadcast %cst_112 : f32 to vector<8x32xf32>
    %383 = arith.addf %382, %381 : vector<8x32xf32>
    %384 = arith.divf %382, %383 : vector<8x32xf32>
    %385 = vector.extract_strided_slice %378 {offsets = [0, 32], sizes = [8, 32], strides = [1, 1]} : vector<8x128xf32> to vector<8x32xf32>
    %386 = arith.negf %385 : vector<8x32xf32>
    %387 = math.exp %386 : vector<8x32xf32>
    %cst_113 = arith.constant 1.000000e+00 : f32
    %388 = vector.broadcast %cst_113 : f32 to vector<8x32xf32>
    %389 = arith.addf %388, %387 : vector<8x32xf32>
    %390 = arith.divf %388, %389 : vector<8x32xf32>
    %391 = vector.extract_strided_slice %378 {offsets = [0, 64], sizes = [8, 32], strides = [1, 1]} : vector<8x128xf32> to vector<8x32xf32>
    %392 = math.tanh %391 : vector<8x32xf32>
    %393 = vector.extract_strided_slice %378 {offsets = [0, 96], sizes = [8, 32], strides = [1, 1]} : vector<8x128xf32> to vector<8x32xf32>
    %394 = arith.negf %393 : vector<8x32xf32>
    %395 = math.exp %394 : vector<8x32xf32>
    %cst_114 = arith.constant 1.000000e+00 : f32
    %396 = vector.broadcast %cst_114 : f32 to vector<8x32xf32>
    %397 = arith.addf %396, %395 : vector<8x32xf32>
    %398 = arith.divf %396, %397 : vector<8x32xf32>
    %399 = arith.mulf %390, %370 : vector<8x32xf32>
    %400 = arith.mulf %384, %392 : vector<8x32xf32>
    %401 = arith.addf %399, %400 : vector<8x32xf32>
    %402 = math.tanh %401 : vector<8x32xf32>
    %403 = arith.mulf %398, %402 : vector<8x32xf32>
    %c3_i32_115 = arith.constant 3 : i32
    %404 = arith.index_cast %c3_i32_115 : i32 to index
    %c0_116 = arith.constant 0 : index
    %c0_117 = arith.constant 0 : index
    %405 = vector.load %arg8[%404, %c0_116, %c0_117] : memref<8x8x128xf32, #tpu.memory_space<vmem>>, vector<1x8x128xf32>
    %406 = vector.shape_cast %405 : vector<1x8x128xf32> to vector<8x128xf32>
    %407 = arith.truncf %403 : vector<8x32xf32> to vector<8x32xbf16>
    %cst_118 = arith.constant dense<0.000000e+00> : vector<8x128xf32>
    %408 = tpu.matmul %407, %309, %cst_118 {dimension_numbers = #tpu.dot_dimension_numbers<[1], [0], [0], [1], [0, 0, 1, 1], [], []>} : vector<8x32xbf16>, vector<32x128xbf16>, vector<8x128xf32> -> vector<8x128xf32>
    %409 = arith.addf %406, %408 : vector<8x128xf32>
    %410 = vector.extract_strided_slice %409 {offsets = [0, 0], sizes = [8, 32], strides = [1, 1]} : vector<8x128xf32> to vector<8x32xf32>
    %411 = arith.negf %410 : vector<8x32xf32>
    %412 = math.exp %411 : vector<8x32xf32>
    %cst_119 = arith.constant 1.000000e+00 : f32
    %413 = vector.broadcast %cst_119 : f32 to vector<8x32xf32>
    %414 = arith.addf %413, %412 : vector<8x32xf32>
    %415 = arith.divf %413, %414 : vector<8x32xf32>
    %416 = vector.extract_strided_slice %409 {offsets = [0, 32], sizes = [8, 32], strides = [1, 1]} : vector<8x128xf32> to vector<8x32xf32>
    %417 = arith.negf %416 : vector<8x32xf32>
    %418 = math.exp %417 : vector<8x32xf32>
    %cst_120 = arith.constant 1.000000e+00 : f32
    %419 = vector.broadcast %cst_120 : f32 to vector<8x32xf32>
    %420 = arith.addf %419, %418 : vector<8x32xf32>
    %421 = arith.divf %419, %420 : vector<8x32xf32>
    %422 = vector.extract_strided_slice %409 {offsets = [0, 64], sizes = [8, 32], strides = [1, 1]} : vector<8x128xf32> to vector<8x32xf32>
    %423 = math.tanh %422 : vector<8x32xf32>
    %424 = vector.extract_strided_slice %409 {offsets = [0, 96], sizes = [8, 32], strides = [1, 1]} : vector<8x128xf32> to vector<8x32xf32>
    %425 = arith.negf %424 : vector<8x32xf32>
    %426 = math.exp %425 : vector<8x32xf32>
    %cst_121 = arith.constant 1.000000e+00 : f32
    %427 = vector.broadcast %cst_121 : f32 to vector<8x32xf32>
    %428 = arith.addf %427, %426 : vector<8x32xf32>
    %429 = arith.divf %427, %428 : vector<8x32xf32>
    %430 = arith.mulf %421, %401 : vector<8x32xf32>
    %431 = arith.mulf %415, %423 : vector<8x32xf32>
    %432 = arith.addf %430, %431 : vector<8x32xf32>
    %433 = math.tanh %432 : vector<8x32xf32>
    %434 = arith.mulf %429, %433 : vector<8x32xf32>
    %c4_i32_122 = arith.constant 4 : i32
    %435 = arith.index_cast %c4_i32_122 : i32 to index
    %c0_123 = arith.constant 0 : index
    %c0_124 = arith.constant 0 : index
    %436 = vector.load %arg8[%435, %c0_123, %c0_124] : memref<8x8x128xf32, #tpu.memory_space<vmem>>, vector<1x8x128xf32>
    %437 = vector.shape_cast %436 : vector<1x8x128xf32> to vector<8x128xf32>
    %438 = arith.truncf %434 : vector<8x32xf32> to vector<8x32xbf16>
    %cst_125 = arith.constant dense<0.000000e+00> : vector<8x128xf32>
    %439 = tpu.matmul %438, %309, %cst_125 {dimension_numbers = #tpu.dot_dimension_numbers<[1], [0], [0], [1], [0, 0, 1, 1], [], []>} : vector<8x32xbf16>, vector<32x128xbf16>, vector<8x128xf32> -> vector<8x128xf32>
    %440 = arith.addf %437, %439 : vector<8x128xf32>
    %441 = vector.extract_strided_slice %440 {offsets = [0, 0], sizes = [8, 32], strides = [1, 1]} : vector<8x128xf32> to vector<8x32xf32>
    %442 = arith.negf %441 : vector<8x32xf32>
    %443 = math.exp %442 : vector<8x32xf32>
    %cst_126 = arith.constant 1.000000e+00 : f32
    %444 = vector.broadcast %cst_126 : f32 to vector<8x32xf32>
    %445 = arith.addf %444, %443 : vector<8x32xf32>
    %446 = arith.divf %444, %445 : vector<8x32xf32>
    %447 = vector.extract_strided_slice %440 {offsets = [0, 32], sizes = [8, 32], strides = [1, 1]} : vector<8x128xf32> to vector<8x32xf32>
    %448 = arith.negf %447 : vector<8x32xf32>
    %449 = math.exp %448 : vector<8x32xf32>
    %cst_127 = arith.constant 1.000000e+00 : f32
    %450 = vector.broadcast %cst_127 : f32 to vector<8x32xf32>
    %451 = arith.addf %450, %449 : vector<8x32xf32>
    %452 = arith.divf %450, %451 : vector<8x32xf32>
    %453 = vector.extract_strided_slice %440 {offsets = [0, 64], sizes = [8, 32], strides = [1, 1]} : vector<8x128xf32> to vector<8x32xf32>
    %454 = math.tanh %453 : vector<8x32xf32>
    %455 = vector.extract_strided_slice %440 {offsets = [0, 96], sizes = [8, 32], strides = [1, 1]} : vector<8x128xf32> to vector<8x32xf32>
    %456 = arith.negf %455 : vector<8x32xf32>
    %457 = math.exp %456 : vector<8x32xf32>
    %cst_128 = arith.constant 1.000000e+00 : f32
    %458 = vector.broadcast %cst_128 : f32 to vector<8x32xf32>
    %459 = arith.addf %458, %457 : vector<8x32xf32>
    %460 = arith.divf %458, %459 : vector<8x32xf32>
    %461 = arith.mulf %452, %432 : vector<8x32xf32>
    %462 = arith.mulf %446, %454 : vector<8x32xf32>
    %463 = arith.addf %461, %462 : vector<8x32xf32>
    %464 = math.tanh %463 : vector<8x32xf32>
    %465 = arith.mulf %460, %464 : vector<8x32xf32>
    %c5_i32_129 = arith.constant 5 : i32
    %466 = arith.index_cast %c5_i32_129 : i32 to index
    %c0_130 = arith.constant 0 : index
    %c0_131 = arith.constant 0 : index
    %467 = vector.load %arg8[%466, %c0_130, %c0_131] : memref<8x8x128xf32, #tpu.memory_space<vmem>>, vector<1x8x128xf32>
    %468 = vector.shape_cast %467 : vector<1x8x128xf32> to vector<8x128xf32>
    %469 = arith.truncf %465 : vector<8x32xf32> to vector<8x32xbf16>
    %cst_132 = arith.constant dense<0.000000e+00> : vector<8x128xf32>
    %470 = tpu.matmul %469, %309, %cst_132 {dimension_numbers = #tpu.dot_dimension_numbers<[1], [0], [0], [1], [0, 0, 1, 1], [], []>} : vector<8x32xbf16>, vector<32x128xbf16>, vector<8x128xf32> -> vector<8x128xf32>
    %471 = arith.addf %468, %470 : vector<8x128xf32>
    %472 = vector.extract_strided_slice %471 {offsets = [0, 0], sizes = [8, 32], strides = [1, 1]} : vector<8x128xf32> to vector<8x32xf32>
    %473 = arith.negf %472 : vector<8x32xf32>
    %474 = math.exp %473 : vector<8x32xf32>
    %cst_133 = arith.constant 1.000000e+00 : f32
    %475 = vector.broadcast %cst_133 : f32 to vector<8x32xf32>
    %476 = arith.addf %475, %474 : vector<8x32xf32>
    %477 = arith.divf %475, %476 : vector<8x32xf32>
    %478 = vector.extract_strided_slice %471 {offsets = [0, 32], sizes = [8, 32], strides = [1, 1]} : vector<8x128xf32> to vector<8x32xf32>
    %479 = arith.negf %478 : vector<8x32xf32>
    %480 = math.exp %479 : vector<8x32xf32>
    %cst_134 = arith.constant 1.000000e+00 : f32
    %481 = vector.broadcast %cst_134 : f32 to vector<8x32xf32>
    %482 = arith.addf %481, %480 : vector<8x32xf32>
    %483 = arith.divf %481, %482 : vector<8x32xf32>
    %484 = vector.extract_strided_slice %471 {offsets = [0, 64], sizes = [8, 32], strides = [1, 1]} : vector<8x128xf32> to vector<8x32xf32>
    %485 = math.tanh %484 : vector<8x32xf32>
    %486 = vector.extract_strided_slice %471 {offsets = [0, 96], sizes = [8, 32], strides = [1, 1]} : vector<8x128xf32> to vector<8x32xf32>
    %487 = arith.negf %486 : vector<8x32xf32>
    %488 = math.exp %487 : vector<8x32xf32>
    %cst_135 = arith.constant 1.000000e+00 : f32
    %489 = vector.broadcast %cst_135 : f32 to vector<8x32xf32>
    %490 = arith.addf %489, %488 : vector<8x32xf32>
    %491 = arith.divf %489, %490 : vector<8x32xf32>
    %492 = arith.mulf %483, %463 : vector<8x32xf32>
    %493 = arith.mulf %477, %485 : vector<8x32xf32>
    %494 = arith.addf %492, %493 : vector<8x32xf32>
    %495 = math.tanh %494 : vector<8x32xf32>
    %496 = arith.mulf %491, %495 : vector<8x32xf32>
    %c6_i32_136 = arith.constant 6 : i32
    %497 = arith.index_cast %c6_i32_136 : i32 to index
    %c0_137 = arith.constant 0 : index
    %c0_138 = arith.constant 0 : index
    %498 = vector.load %arg8[%497, %c0_137, %c0_138] : memref<8x8x128xf32, #tpu.memory_space<vmem>>, vector<1x8x128xf32>
    %499 = vector.shape_cast %498 : vector<1x8x128xf32> to vector<8x128xf32>
    %500 = arith.truncf %496 : vector<8x32xf32> to vector<8x32xbf16>
    %cst_139 = arith.constant dense<0.000000e+00> : vector<8x128xf32>
    %501 = tpu.matmul %500, %309, %cst_139 {dimension_numbers = #tpu.dot_dimension_numbers<[1], [0], [0], [1], [0, 0, 1, 1], [], []>} : vector<8x32xbf16>, vector<32x128xbf16>, vector<8x128xf32> -> vector<8x128xf32>
    %502 = arith.addf %499, %501 : vector<8x128xf32>
    %503 = vector.extract_strided_slice %502 {offsets = [0, 0], sizes = [8, 32], strides = [1, 1]} : vector<8x128xf32> to vector<8x32xf32>
    %504 = arith.negf %503 : vector<8x32xf32>
    %505 = math.exp %504 : vector<8x32xf32>
    %cst_140 = arith.constant 1.000000e+00 : f32
    %506 = vector.broadcast %cst_140 : f32 to vector<8x32xf32>
    %507 = arith.addf %506, %505 : vector<8x32xf32>
    %508 = arith.divf %506, %507 : vector<8x32xf32>
    %509 = vector.extract_strided_slice %502 {offsets = [0, 32], sizes = [8, 32], strides = [1, 1]} : vector<8x128xf32> to vector<8x32xf32>
    %510 = arith.negf %509 : vector<8x32xf32>
    %511 = math.exp %510 : vector<8x32xf32>
    %cst_141 = arith.constant 1.000000e+00 : f32
    %512 = vector.broadcast %cst_141 : f32 to vector<8x32xf32>
    %513 = arith.addf %512, %511 : vector<8x32xf32>
    %514 = arith.divf %512, %513 : vector<8x32xf32>
    %515 = vector.extract_strided_slice %502 {offsets = [0, 64], sizes = [8, 32], strides = [1, 1]} : vector<8x128xf32> to vector<8x32xf32>
    %516 = math.tanh %515 : vector<8x32xf32>
    %517 = vector.extract_strided_slice %502 {offsets = [0, 96], sizes = [8, 32], strides = [1, 1]} : vector<8x128xf32> to vector<8x32xf32>
    %518 = arith.negf %517 : vector<8x32xf32>
    %519 = math.exp %518 : vector<8x32xf32>
    %cst_142 = arith.constant 1.000000e+00 : f32
    %520 = vector.broadcast %cst_142 : f32 to vector<8x32xf32>
    %521 = arith.addf %520, %519 : vector<8x32xf32>
    %522 = arith.divf %520, %521 : vector<8x32xf32>
    %523 = arith.mulf %514, %494 : vector<8x32xf32>
    %524 = arith.mulf %508, %516 : vector<8x32xf32>
    %525 = arith.addf %523, %524 : vector<8x32xf32>
    %526 = math.tanh %525 : vector<8x32xf32>
    %527 = arith.mulf %522, %526 : vector<8x32xf32>
    %c7_i32_143 = arith.constant 7 : i32
    %528 = arith.index_cast %c7_i32_143 : i32 to index
    %c0_144 = arith.constant 0 : index
    %c0_145 = arith.constant 0 : index
    %529 = vector.load %arg8[%528, %c0_144, %c0_145] : memref<8x8x128xf32, #tpu.memory_space<vmem>>, vector<1x8x128xf32>
    %530 = vector.shape_cast %529 : vector<1x8x128xf32> to vector<8x128xf32>
    %531 = arith.truncf %527 : vector<8x32xf32> to vector<8x32xbf16>
    %cst_146 = arith.constant dense<0.000000e+00> : vector<8x128xf32>
    %532 = tpu.matmul %531, %309, %cst_146 {dimension_numbers = #tpu.dot_dimension_numbers<[1], [0], [0], [1], [0, 0, 1, 1], [], []>} : vector<8x32xbf16>, vector<32x128xbf16>, vector<8x128xf32> -> vector<8x128xf32>
    %533 = arith.addf %530, %532 : vector<8x128xf32>
    %534 = vector.extract_strided_slice %533 {offsets = [0, 0], sizes = [8, 32], strides = [1, 1]} : vector<8x128xf32> to vector<8x32xf32>
    %535 = arith.negf %534 : vector<8x32xf32>
    %536 = math.exp %535 : vector<8x32xf32>
    %cst_147 = arith.constant 1.000000e+00 : f32
    %537 = vector.broadcast %cst_147 : f32 to vector<8x32xf32>
    %538 = arith.addf %537, %536 : vector<8x32xf32>
    %539 = arith.divf %537, %538 : vector<8x32xf32>
    %540 = vector.extract_strided_slice %533 {offsets = [0, 32], sizes = [8, 32], strides = [1, 1]} : vector<8x128xf32> to vector<8x32xf32>
    %541 = arith.negf %540 : vector<8x32xf32>
    %542 = math.exp %541 : vector<8x32xf32>
    %cst_148 = arith.constant 1.000000e+00 : f32
    %543 = vector.broadcast %cst_148 : f32 to vector<8x32xf32>
    %544 = arith.addf %543, %542 : vector<8x32xf32>
    %545 = arith.divf %543, %544 : vector<8x32xf32>
    %546 = vector.extract_strided_slice %533 {offsets = [0, 64], sizes = [8, 32], strides = [1, 1]} : vector<8x128xf32> to vector<8x32xf32>
    %547 = math.tanh %546 : vector<8x32xf32>
    %548 = vector.extract_strided_slice %533 {offsets = [0, 96], sizes = [8, 32], strides = [1, 1]} : vector<8x128xf32> to vector<8x32xf32>
    %549 = arith.negf %548 : vector<8x32xf32>
    %550 = math.exp %549 : vector<8x32xf32>
    %cst_149 = arith.constant 1.000000e+00 : f32
    %551 = vector.broadcast %cst_149 : f32 to vector<8x32xf32>
    %552 = arith.addf %551, %550 : vector<8x32xf32>
    %553 = arith.divf %551, %552 : vector<8x32xf32>
    %554 = arith.mulf %545, %525 : vector<8x32xf32>
    %555 = arith.mulf %539, %547 : vector<8x32xf32>
    %556 = arith.addf %554, %555 : vector<8x32xf32>
    %557 = math.tanh %556 : vector<8x32xf32>
    %558 = arith.mulf %553, %557 : vector<8x32xf32>
    %c8_i32_150 = arith.constant 8 : i32
    %559 = arith.truncf %558 : vector<8x32xf32> to vector<8x32xbf16>
    %c0_151 = arith.constant 0 : index
    %c0_152 = arith.constant 0 : index
    %560 = vector.load %arg5[%c0_151, %c0_152] : memref<32x4xbf16, #tpu.memory_space<vmem>>, vector<32x4xbf16>
    %cst_153 = arith.constant dense<0.000000e+00> : vector<8x4xf32>
    %561 = tpu.matmul %559, %560, %cst_153 {dimension_numbers = #tpu.dot_dimension_numbers<[1], [0], [0], [1], [0, 0, 1, 1], [], []>} : vector<8x32xbf16>, vector<32x4xbf16>, vector<8x4xf32> -> vector<8x4xf32>
    %c0_154 = arith.constant 0 : index
    %c0_155 = arith.constant 0 : index
    %562 = vector.load %arg6[%c0_154, %c0_155] : memref<1x4xf32, #tpu.memory_space<vmem>>, vector<1x4xf32>
    %563 = vector.broadcast %562 : vector<1x4xf32> to vector<8x4xf32>
    %564 = arith.addf %561, %563 : vector<8x4xf32>
    %c0_156 = arith.constant 0 : index
    %c0_157 = arith.constant 0 : index
    %565 = vector.load %arg7[%c0_156, %c0_157] : memref<8x4xf32, #tpu.memory_space<vmem>>, vector<8x4xf32>
    tpu.vector_store %arg7[%c0_156, %c0_157], %564 {strides = array<i32>} : memref<8x4xf32, #tpu.memory_space<vmem>>, vector<8x4xf32>,
    return
  }
}

</mosaic_0001>

<bundles_post_ra>
// kernel: lstm_model_forward.1
= control target key start
LH: loop header
LB: loop body
LE: loop exit
PB: predicated region body
PF: predicated region fallthrough
CT: control target
= control target key end

     0   :  { %v2016_v0 = vmov 0.0   ;;  %vm2017_vm0 = vmmov 0   ;;  %vm47_vm1 = vcmask 130048   ;;  %v2018_v10 = vmov 0   ;;  %s2019_s16 = smov 64   ;;  %s2020_s17 = smov 32   ;;  %s2434_s1 = inlined_call_operand.vmem [shape: bf16[16,128], index: 1, kind: input, shape index: {}]   ;;  %s2435_s3 = inlined_call_operand.vmem [shape: bf16[2,32,128], index: 3, kind: input, shape index: {}]   ;;  %s2436_s0 = inlined_call_operand.vmem [shape: f32[8,8,16], index: 0, kind: input, shape index: {}]   ;;  %s2437_s4 = inlined_call_operand.vmem [shape: f32[2,1,128], index: 4, kind: input, shape index: {}]   ;;  %s2438_s2 = inlined_call_operand.vmem [shape: bf16[1,32,128], index: 2, kind: input, shape index: {}]   ;;  %s2439_s5 = inlined_call_operand.vmem [shape: bf16[32,4], index: 5, kind: input, shape index: {}]   ;;  %s2440_s6 = inlined_call_operand.vmem [shape: f32[1,4], index: 6, kind: input, shape index: {}]   ;;  %s2441_s7 = inlined_call_operand.vmem [shape: f32[8,4], index: 7, kind: output, shape index: {}]  }
   0x1   :  { %1726 = vmatprep.subr.bf16.mxu1 %v2016_v0  ;;  %v1879_v1 = vld [vmem:[%s2434_s1] sm:$0xff]   ;;  %1730 = vmatprep.mubr.msk.bf16.mxu1 %vm2017_vm0, %v2016_v0  ;;  %v28_v4 = vld [vmem:[%s2436_s0 + $0x8] sm:$0xff]  ;;  %v29_v5 = vld [vmem:[%s2436_s0 + $0x10] sm:$0xff]  ;;  %vm165_vm2 = vcmask 261120   ;;  %vm1592_vm3 = vcmask 31744  }
   0x2   :  { %v2070_v2 = vld [vmem:[%s2435_s3] sm:$0xff]   ;;  %1716 = vmatprep.subr.bf16.mxu0 %v1879_v1  ;;  %v30_v7 = vld [vmem:[%s2436_s0 + $0x18] sm:$0xff]  ;;  %v2089_v9 = vld [vmem:[%s2435_s3 + $0x8] sm:$0xff]  }
   0x3   :  { %v27_v3 = vld [vmem:[%s2436_s0] sm:$0xff]  ;;  %1727 = vmatpush3.bf16.msra.mxu1 %v2070_v2  ;;  %1717 = vmatpush3.bf16.msra.mxu0 %v1879_v1  ;;  %v38_v8 = vpack.c.bf16 %v30_v7, %v29_v5  ;;  %v32_v54 = vld [vmem:[%s2436_s0 + $0x28] sm:$0xff]  ;;  %v33_v55 = vld [vmem:[%s2436_s0 + $0x30] sm:$0xff] }
   0x4   :  { %v37_v6 = vpack.c.bf16 %v28_v4, %v27_v3  ;;  %1728 = vmatprep.subr.bf16.mxu1 %v2016_v0  ;;  %1742 = vmatprep.subr.bf16.mxu0 %v2016_v0  ;;  %v2110_v11 = vld [vmem:[%s2437_s4] ss:$0 sm:$0xff]  ;;  %v34_v57 = vld [vmem:[%s2436_s0 + $0x38] sm:$0xff] }
   0x5   :  { %v31_v53 = vld [vmem:[%s2436_s0 + $0x20] sm:$0xff]  ;;  %v40_v58 = vpack.c.bf16 %v34_v57, %v33_v55 }
   0x6   :  { %1718 = vmatprep.mubr.msk.bf16.mxu0 %vm47_vm1, %v37_v6  ;;  %v39_v56 = vpack.c.bf16 %v32_v54, %v31_v53 }
   0x7   :  { %1719 = vmatmul.mubr.msk.bf16.vlgmr.msra.gmra.mrb[0].mxu0 %vm47_vm1, %v38_v8  ;;  %1729 = vmatpush3.bf16.msra.mxu1 %v2089_v9 }
   0x8   :  { %1743 = vmatpush3.bf16.msra.mxu0 %v2070_v2  ;;  %1734 = vmatprep.subr.bf16.mxu1 %v2016_v0 }
   0x9   :  { %1744 = vmatprep.subr.bf16.mxu0 %v2016_v0  ;;  %1722 = vmatprep.mubr.msk.bf16.mxu0 %vm47_vm1, %v39_v56 }
   0xa   :  { %1731 = vmatmul.mubr.bf16.vlgmr.msra.gmra.mrb[0].mxu1 %v2018_v10 }
   0xb   :  { %1735 = vmatpush3.bf16.msra.mxu1 %v2070_v2  ;;  %1738 = vmatprep.mubr.msk.bf16.mxu1 %vm2017_vm0, %v2016_v0 }
   0xc   :  { %1736 = vmatprep.subr.bf16.mxu1 %v2016_v0  ;;  %1745 = vmatpush3.bf16.msra.mxu0 %v2089_v9 }
   0xd   :  { %1758 = vmatprep.subr.bf16.mxu0 %v2016_v0 }
   0xf   :  { %1737 = vmatpush3.bf16.msra.mxu1 %v2089_v9  ;;  %1723 = vmatmul.mubr.msk.bf16.gmra.mrb[4].mxu0 %vm47_vm1, %v40_v58 }
  0x10   :  { %1750 = vmatprep.subr.bf16.mxu1 %v2016_v0  ;;  %1746 = vmatprep.mubr.msk.bf16.mxu0 %vm2017_vm0, %v2016_v0 }
  0xda   :  { %v2112_v12 = vpop.f32.mrb[0].mxu0 }
  0xdb   :  { %v94_v13 = vpop.f32.mrb[1].mxu0  ;;  %v134_v6 = vadd.f32 %v2112_v12, %v2110_v11 }
  0xdc   :  { %v132_v14 = vadd.f32 %v2110_v11, %v94_v13  ;;  %v2115_v15 = vpop.f32.mrb[2].mxu0 }
  0xdd   :  { %v97_v16 = vpop.f32.mrb[3].mxu0  ;;  %v203_v17 = vpop.f32.mrb[0].mxu1 }
  0xde   :  { %v209_v18 = vadd.f32 %v203_v17, %v132_v14  ;;  %v1732_v19 = vpop.f32.mrb[1].mxu1  ;;  %v133_v37 = vadd.f32 %v2110_v11, %v97_v16 }
  0xdf   :  { %v206_v20 = vpop.f32.mrb[2].mxu1 }
  0xe0   :  { %1888 = vtanh.f32 %v209_v18  ;;  %v1733_v21 = vpop.f32.mrb[3].mxu1  ;;  %v1606_v23 = vmul.f32 -1.442695, %v209_v18 }
  0xe2   :  { %1890 = vpow2.f32 %v1606_v23  ;;  %v2157_v63 = vpop.f32.mrb[4].mxu0 }
  0xe3   :  { %v2159_v1 = vpop.f32.mrb[5].mxu0 }
  0xe4   :  { %v2161_v3 = vpop.f32.mrb[6].mxu0 }
  0xe5   :  { %v2163_v4 = vpop.f32.mrb[7].mxu0 }
  0xea   :  { %v1889_v22 = vpop.eup %1888 }
  0xeb   :  { %219 = vrot.lane.b32.xlu0 %v1889_v22, %s2019_s16 }
  0xec   :  { %v1891_v24 = vpop.eup %1890 }
  0xed   :  { %v213_v25 = vadd.f32 1.0, %v1891_v24 }
  0xef   :  { %1892 = vrcp.f32 %v213_v25 }
  0xf9   :  { %v1893_v26 = vpop.eup %1892 }
  0xfa   :  { %v217_v29 = vmul.f32 0.0, %v1893_v26 }
 0x15d   :  { %v220_v27 = vpop.permute.xlu0 %219 }
 0x15e   :  { %v222_v28 = vmul.f32 %v1893_v26, %v220_v27 }
 0x160   :  { %224 = vrot.lane.b32.xlu0 %v222_v28, %s2020_s17 }
 0x1d2   :  { %v225_v30 = vpop.permute.xlu0 %224 }
 0x1d3   :  { %v227_v31 = vadd.f32 %v225_v30, %v217_v29 }
 0x1d5   :  { %1894 = vtanh.f32 %v227_v31 }
 0x1df   :  { %v1895_v32 = vpop.eup %1894 }
 0x1e0   :  { %230 = vrot.lane.b32.xlu1 %v1895_v32, %s2019_s16 }
 0x252   :  { %v231_v33 = vpop.permute.xlu1 %230 }
 0x253   :  { %v2120_v34 = vmul.f32 %v1893_v26, %v231_v33 }
 0x255   :  { %v241_v35 = vpack.c.bf16 %v2120_v34, %v2120_v34 }
 0x257   :  { %243 = vrot.lane.b32.xlu1 %v241_v35, %s2020_s17 }
 0x2c9   :  { %v244_v36 = vpop.permute.xlu1 %243 }
 0x2ca   :  { %1739 = vmatmul.mubr.msk.bf16.vlgmr.msra.gmra.mrb[4].mxu1 %vm165_vm2, %v244_v36 }
 0x2cb   :  { %1751 = vmatpush3.bf16.msra.mxu1 %v2070_v2  ;;  %1754 = vmatprep.mubr.msk.bf16.mxu1 %vm2017_vm0, %v2016_v0 }
 0x2cc   :  { %1752 = vmatprep.subr.bf16.mxu1 %v2016_v0 }
 0x2cf   :  { %1753 = vmatpush3.bf16.msra.mxu1 %v2089_v9 }
 0x2d0   :  { %1766 = vmatprep.subr.bf16.mxu1 %v2016_v0 }
 0x39d   :  { %v282_v38 = vpop.f32.mrb[4].mxu1 }
 0x39e   :  { %v288_v39 = vadd.f32 %v282_v38, %v133_v37  ;;  %v1740_v40 = vpop.f32.mrb[5].mxu1 }
 0x39f   :  { %v285_v41 = vpop.f32.mrb[6].mxu1 }
 0x3a0   :  { %1896 = vtanh.f32 %v288_v39  ;;  %v1741_v42 = vpop.f32.mrb[7].mxu1  ;;  %v1608_v44 = vmul.f32 -1.442695, %v288_v39 }
 0x3a2   :  { %1898 = vpow2.f32 %v1608_v44 }
 0x3aa   :  { %v1897_v43 = vpop.eup %1896 }
 0x3ab   :  { %298 = vrot.lane.b32.xlu0 %v1897_v43, %s2019_s16 }
 0x3ac   :  { %v1899_v45 = vpop.eup %1898 }
 0x3ad   :  { %v292_v46 = vadd.f32 1.0, %v1899_v45 }
 0x3af   :  { %1900 = vrcp.f32 %v292_v46 }
 0x3b9   :  { %v1901_v47 = vpop.eup %1900 }
 0x3ba   :  { %v296_v50 = vmul.f32 %v1901_v47, %v227_v31  ;;  %v135_v31 = vadd.f32 %v2115_v15, %v2110_v11 }
 0x41d   :  { %v299_v48 = vpop.permute.xlu0 %298 }
 0x41e   :  { %v301_v49 = vmul.f32 %v1901_v47, %v299_v48 }
 0x420   :  { %303 = vrot.lane.b32.xlu1 %v301_v49, %s2020_s17 }
 0x492   :  { %v304_v51 = vpop.permute.xlu1 %303 }
 0x493   :  { %v306_v52 = vadd.f32 %v304_v51, %v296_v50 }
 0x495   :  { %1902 = vtanh.f32 %v306_v52 }
 0x49f   :  { %v1903_v59 = vpop.eup %1902 }
 0x4a0   :  { %309 = vrot.lane.b32.xlu0 %v1903_v59, %s2019_s16 }
 0x512   :  { %v310_v60 = vpop.permute.xlu0 %309 }
 0x513   :  { %v2152_v61 = vmul.f32 %v1901_v47, %v310_v60 }
 0x515   :  { %v321_v62 = vpack.c.bf16 %v2152_v61, %v2152_v61 }
 0x517   :  { %323 = vrot.lane.b32.xlu1 %v321_v62, %s2020_s17 }
 0x589   :  { %v324_v5 = vpop.permute.xlu1 %323 }
 0x58a   :  { %1747 = vmatmul.mubr.msk.bf16.vlgmr.msra.gmra.mrb[8].mxu0 %vm165_vm2, %v324_v5 }
 0x58b   :  { %1759 = vmatpush3.bf16.msra.mxu0 %v2070_v2  ;;  %1762 = vmatprep.mubr.msk.bf16.mxu0 %vm2017_vm0, %v2016_v0 }
 0x58c   :  { %1760 = vmatprep.subr.bf16.mxu0 %v2016_v0 }
 0x58f   :  { %1761 = vmatpush3.bf16.msra.mxu0 %v2089_v9 }
 0x590   :  { %1774 = vmatprep.subr.bf16.mxu0 %v2016_v0 }
 0x65d   :  { %v362_v7 = vpop.f32.mrb[8].mxu0 }
 0x65e   :  { %v368_v8 = vadd.f32 %v362_v7, %v134_v6  ;;  %v1748_v13 = vpop.f32.mrb[9].mxu0 }
 0x65f   :  { %v365_v14 = vpop.f32.mrb[10].mxu0 }
 0x660   :  { %1904 = vtanh.f32 %v368_v8  ;;  %v1749_v16 = vpop.f32.mrb[11].mxu0  ;;  %v1610_v18 = vmul.f32 -1.442695, %v368_v8 }
 0x662   :  { %1906 = vpow2.f32 %v1610_v18 }
 0x66a   :  { %v1905_v17 = vpop.eup %1904 }
 0x66b   :  { %378 = vrot.lane.b32.xlu0 %v1905_v17, %s2019_s16 }
 0x66c   :  { %v1907_v19 = vpop.eup %1906 }
 0x66d   :  { %v372_v20 = vadd.f32 1.0, %v1907_v19 }
 0x66f   :  { %1908 = vrcp.f32 %v372_v20  ;;  %v137_v20 = vadd.f32 %v2110_v11, %v2163_v4 }
 0x679   :  { %v1909_v21 = vpop.eup %1908 }
 0x67a   :  { %v376_v12 = vmul.f32 %v1909_v21, %v306_v52  ;;  %v136_v52 = vadd.f32 %v2110_v11, %v2159_v1 }
 0x6dd   :  { %v379_v22 = vpop.permute.xlu0 %378 }
 0x6de   :  { %v381_v23 = vmul.f32 %v1909_v21, %v379_v22 }
 0x6e0   :  { %383 = vrot.lane.b32.xlu1 %v381_v23, %s2020_s17 }
 0x752   :  { %v384_v24 = vpop.permute.xlu1 %383 }
 0x753   :  { %v386_v25 = vadd.f32 %v384_v24, %v376_v12 }
 0x755   :  { %1910 = vtanh.f32 %v386_v25 }
 0x75f   :  { %v1911_v26 = vpop.eup %1910 }
 0x760   :  { %389 = vrot.lane.b32.xlu0 %v1911_v26, %s2019_s16 }
 0x7d2   :  { %v390_v27 = vpop.permute.xlu0 %389 }
 0x7d3   :  { %v2177_v28 = vmul.f32 %v1909_v21, %v390_v27 }
 0x7d5   :  { %v401_v29 = vpack.c.bf16 %v2177_v28, %v2177_v28 }
 0x7d7   :  { %403 = vrot.lane.b32.xlu1 %v401_v29, %s2020_s17 }
 0x849   :  { %v404_v30 = vpop.permute.xlu1 %403 }
 0x84a   :  { %1755 = vmatmul.mubr.msk.bf16.vlgmr.msra.gmra.mrb[8].mxu1 %vm165_vm2, %v404_v30 }
 0x84b   :  { %1767 = vmatpush3.bf16.msra.mxu1 %v2070_v2  ;;  %1770 = vmatprep.mubr.msk.bf16.mxu1 %vm2017_vm0, %v2016_v0 }
 0x84c   :  { %1768 = vmatprep.subr.bf16.mxu1 %v2016_v0 }
 0x84f   :  { %1769 = vmatpush3.bf16.msra.mxu1 %v2089_v9 }
 0x850   :  { %1782 = vmatprep.subr.bf16.mxu1 %v2016_v0 }
 0x91d   :  { %v442_v32 = vpop.f32.mrb[8].mxu1 }
 0x91e   :  { %v448_v33 = vadd.f32 %v442_v32, %v135_v31  ;;  %v1756_v35 = vpop.f32.mrb[9].mxu1 }
 0x91f   :  { %v445_v36 = vpop.f32.mrb[10].mxu1 }
 0x920   :  { %1912 = vtanh.f32 %v448_v33  ;;  %v1757_v37 = vpop.f32.mrb[11].mxu1  ;;  %v1612_v39 = vmul.f32 -1.442695, %v448_v33 }
 0x922   :  { %1914 = vpow2.f32 %v1612_v39  ;;  %v138_v39 = vadd.f32 %v2157_v63, %v2110_v11 }
 0x92a   :  { %v1913_v38 = vpop.eup %1912 }
 0x92b   :  { %458 = vrot.lane.b32.xlu0 %v1913_v38, %s2019_s16 }
 0x92c   :  { %v1915_v40 = vpop.eup %1914 }
 0x92d   :  { %v452_v41 = vadd.f32 1.0, %v1915_v40 }
 0x92f   :  { %1916 = vrcp.f32 %v452_v41 }
 0x939   :  { %v1917_v42 = vpop.eup %1916 }
 0x93a   :  { %v456_v15 = vmul.f32 %v1917_v42, %v386_v25 }
 0x99d   :  { %v459_v43 = vpop.permute.xlu0 %458 }
 0x99e   :  { %v461_v44 = vmul.f32 %v1917_v42, %v459_v43 }
 0x9a0   :  { %463 = vrot.lane.b32.xlu1 %v461_v44, %s2020_s17 }
 0xa12   :  { %v464_v45 = vpop.permute.xlu1 %463 }
 0xa13   :  { %v466_v46 = vadd.f32 %v464_v45, %v456_v15 }
 0xa15   :  { %1918 = vtanh.f32 %v466_v46 }
 0xa1f   :  { %v1919_v47 = vpop.eup %1918 }
 0xa20   :  { %469 = vrot.lane.b32.xlu0 %v1919_v47, %s2019_s16 }
 0xa92   :  { %v470_v48 = vpop.permute.xlu0 %469 }
 0xa93   :  { %v2194_v49 = vmul.f32 %v1917_v42, %v470_v48 }
 0xa95   :  { %v481_v50 = vpack.c.bf16 %v2194_v49, %v2194_v49 }
 0xa97   :  { %483 = vrot.lane.b32.xlu1 %v481_v50, %s2020_s17 }
 0xb09   :  { %v484_v51 = vpop.permute.xlu1 %483 }
 0xb0a   :  { %1763 = vmatmul.mubr.msk.bf16.vlgmr.msra.gmra.mrb[12].mxu0 %vm165_vm2, %v484_v51 }
 0xb0b   :  { %1775 = vmatpush3.bf16.msra.mxu0 %v2070_v2  ;;  %1778 = vmatprep.mubr.msk.bf16.mxu0 %vm2017_vm0, %v2016_v0 }
 0xb0c   :  { %1776 = vmatprep.subr.bf16.mxu0 %v2016_v0 }
 0xb0f   :  { %1777 = vmatpush3.bf16.msra.mxu0 %v2089_v9 }
 0xbdd   :  { %v522_v53 = vpop.f32.mrb[12].mxu0 }
 0xbde   :  { %v528_v54 = vadd.f32 %v522_v53, %v136_v52  ;;  %v1764_v55 = vpop.f32.mrb[13].mxu0 }
 0xbdf   :  { %v525_v56 = vpop.f32.mrb[14].mxu0 }
 0xbe0   :  { %1920 = vtanh.f32 %v528_v54  ;;  %v1765_v57 = vpop.f32.mrb[15].mxu0  ;;  %v1614_v59 = vmul.f32 -1.442695, %v528_v54  ;;  %v1882_v56 = vld [vmem:[%s2438_s2] sm:$0xff]  }
 0xbe1   :  { %1790 = vmatprep.subr.bf16.mxu0 %v1882_v56 }
 0xbe2   :  { %1922 = vpow2.f32 %v1614_v59 }
 0xbea   :  { %v1921_v58 = vpop.eup %1920 }
 0xbeb   :  { %538 = vrot.lane.b32.xlu0 %v1921_v58, %s2019_s16 }
 0xbec   :  { %v1923_v60 = vpop.eup %1922 }
 0xbed   :  { %v532_v62 = vadd.f32 1.0, %v1923_v60 }
 0xbef   :  { %1924 = vrcp.f32 %v532_v62 }
 0xbf9   :  { %v1925_v5 = vpop.eup %1924 }
 0xbfa   :  { %v536_v1 = vmul.f32 %v1925_v5, %v466_v46 }
 0xc5d   :  { %v539_v6 = vpop.permute.xlu0 %538 }
 0xc5e   :  { %v541_v7 = vmul.f32 %v1925_v5, %v539_v6 }
 0xc60   :  { %543 = vrot.lane.b32.xlu1 %v541_v7, %s2020_s17 }
 0xcd2   :  { %v544_v8 = vpop.permute.xlu1 %543 }
 0xcd3   :  { %v546_v13 = vadd.f32 %v544_v8, %v536_v1  ;;  %v2269_v8 = vld [vmem:[%s2435_s3 + $0x10] sm:$0xff]  }
 0xcd5   :  { %1926 = vtanh.f32 %v546_v13 }
 0xcdf   :  { %v1927_v14 = vpop.eup %1926 }
 0xce0   :  { %549 = vrot.lane.b32.xlu0 %v1927_v14, %s2019_s16 }
 0xd52   :  { %v550_v16 = vpop.permute.xlu0 %549 }
 0xd53   :  { %v2210_v17 = vmul.f32 %v1925_v5, %v550_v16 }
 0xd55   :  { %v561_v18 = vpack.c.bf16 %v2210_v17, %v2210_v17 }
 0xd57   :  { %563 = vrot.lane.b32.xlu1 %v561_v18, %s2020_s17 }
 0xdc9   :  { %v564_v19 = vpop.permute.xlu1 %563 }
 0xdca   :  { %1771 = vmatmul.mubr.msk.bf16.vlgmr.msra.gmra.mrb[12].mxu1 %vm165_vm2, %v564_v19 }
 0xdcb   :  { %1783 = vmatpush3.bf16.msra.mxu1 %v2070_v2  ;;  %1786 = vmatprep.mubr.msk.bf16.mxu1 %vm2017_vm0, %v2016_v0 }
 0xdcc   :  { %1784 = vmatprep.subr.bf16.mxu1 %v2016_v0 }
 0xdcf   :  { %1785 = vmatpush3.bf16.msra.mxu1 %v2089_v9 }
 0xdd0   :  { %1802 = vmatprep.subr.bf16.mxu1 %v2016_v0 }
 0xe9d   :  { %v602_v21 = vpop.f32.mrb[12].mxu1 }
 0xe9e   :  { %v608_v22 = vadd.f32 %v602_v21, %v137_v20  ;;  %v1772_v23 = vpop.f32.mrb[13].mxu1 }
 0xe9f   :  { %v605_v12 = vpop.f32.mrb[14].mxu1 }
 0xea0   :  { %1928 = vtanh.f32 %v608_v22  ;;  %v1773_v24 = vpop.f32.mrb[15].mxu1  ;;  %v1616_v2 = vmul.f32 -1.442695, %v608_v22 }
 0xea2   :  { %1930 = vpow2.f32 %v1616_v2 }
 0xeaa   :  { %v1929_v25 = vpop.eup %1928 }
 0xeab   :  { %618 = vrot.lane.b32.xlu0 %v1929_v25, %s2019_s16  ;;  %v2306_v25 = vld [vmem:[%s2437_s4 + $0x1] ss:$0 sm:$0xff] }
 0xeac   :  { %v1931_v26 = vpop.eup %1930 }
 0xead   :  { %v612_v27 = vadd.f32 1.0, %v1931_v26 }
 0xeaf   :  { %1932 = vrcp.f32 %v612_v27 }
 0xeb9   :  { %v1933_v9 = vpop.eup %1932 }
 0xeba   :  { %v616_v4 = vmul.f32 %v1933_v9, %v546_v13  ;;  %v2277_v13 = vld [vmem:[%s2435_s3 + $0x18] sm:$0xff]  }
 0xf1d   :  { %v619_v29 = vpop.permute.xlu0 %618 }
 0xf1e   :  { %v621_v30 = vmul.f32 %v1933_v9, %v619_v29 }
 0xf20   :  { %623 = vrot.lane.b32.xlu1 %v621_v30, %s2020_s17 }
 0xf92   :  { %v624_v31 = vpop.permute.xlu1 %623 }
 0xf93   :  { %v626_v32 = vadd.f32 %v624_v31, %v616_v4 }
 0xf95   :  { %1934 = vtanh.f32 %v626_v32 }
 0xf9f   :  { %v1935_v33 = vpop.eup %1934 }
 0xfa0   :  { %629 = vrot.lane.b32.xlu0 %v1935_v33, %s2019_s16 }
0x1012   :  { %v630_v35 = vpop.permute.xlu0 %629 }
0x1013   :  { %v2227_v36 = vmul.f32 %v1933_v9, %v630_v35 }
0x1015   :  { %v641_v37 = vpack.c.bf16 %v2227_v36, %v2227_v36 }
0x1017   :  { %643 = vrot.lane.b32.xlu1 %v641_v37, %s2020_s17 }
0x1089   :  { %v644_v38 = vpop.permute.xlu1 %643 }
0x108a   :  { %1779 = vmatmul.mubr.msk.bf16.vlgmr.msra.gmra.mrb[16].mxu0 %vm165_vm2, %v644_v38 }
0x108b   :  { %1791 = vmatpush3.bf16.msra.mxu0 %v1882_v56 }
0x115d   :  { %v682_v40 = vpop.f32.mrb[16].mxu0 }
0x115e   :  { %v688_v41 = vadd.f32 %v682_v40, %v138_v39  ;;  %v1780_v42 = vpop.f32.mrb[17].mxu0 }
0x115f   :  { %v685_v43 = vpop.f32.mrb[18].mxu0 }
0x1160   :  { %1936 = vtanh.f32 %v688_v41  ;;  %v1781_v44 = vpop.f32.mrb[19].mxu0  ;;  %v1618_v45 = vmul.f32 -1.442695, %v688_v41 }
0x1162   :  { %1938 = vpow2.f32 %v1618_v45 }
0x116a   :  { %v1937_v15 = vpop.eup %1936 }
0x116b   :  { %698 = vrot.lane.b32.xlu0 %v1937_v15, %s2019_s16 }
0x116c   :  { %v1939_v46 = vpop.eup %1938 }
0x116d   :  { %v692_v47 = vadd.f32 1.0, %v1939_v46 }
0x116f   :  { %1940 = vrcp.f32 %v692_v47 }
0x1179   :  { %v1941_v48 = vpop.eup %1940 }
0x117a   :  { %v696_v63 = vmul.f32 %v1941_v48, %v626_v32 }
0x11dd   :  { %v699_v50 = vpop.permute.xlu0 %698 }
0x11de   :  { %v701_v51 = vmul.f32 %v1941_v48, %v699_v50 }
0x11e0   :  { %703 = vrot.lane.b32.xlu1 %v701_v51, %s2020_s17 }
0x11e4   :  { %235 = vrot.lane.b32.xlu1 %v2120_v34, %s2020_s17  ;;  %v1883_v34 = vld [vmem:[%s2438_s2 + $0x8] sm:$0xff]  }
0x11e5   :  { %1792 = vmatprep.subr.bf16.mxu0 %v1883_v34 }
0x11e6   :  { %1793 = vmatpush3.bf16.msra.mxu0 %v1883_v34 }
0x11e7   :  { %1818 = vmatprep.subr.bf16.mxu0 %v2016_v0 }
0x11e8   :  { %394 = vrot.lane.b32.xlu1 %v2177_v28, %s2020_s17 }
0x1252   :  { %v704_v52 = vpop.permute.xlu1 %703 }
0x1253   :  { %v2241_v53 = vadd.f32 %v704_v52, %v696_v63 }
0x1255   :  { %1942 = vtanh.f32 %v2241_v53 }
0x1256   :  { %v236_v54 = vpop.permute.xlu1 %235 }
0x1257   :  { %238 = vst.msk [vmem:[#allocation3] sm:$0xff] %vm165_vm2, %v236_v54 }
0x125a   :  { %v395_v55 = vpop.permute.xlu1 %394 }
0x125b   :  { %398 = vst.msk [vmem:[#allocation3 + $0x10] sm:$0xff] %vm165_vm2, %v395_v55 }
0x125e   :  { %v799_v5 = vld [vmem:[#allocation3] sm:$0xff] }
0x125f   :  { %v1943_v28 = vpop.eup %1942 }
0x1260   :  { %709 = vrot.lane.b32.xlu0 %v1943_v28, %s2019_s16 }
0x1264   :  { %314 = vrot.lane.b32.xlu0 %v2152_v61, %s2020_s17 }
0x1268   :  { %474 = vrot.lane.b32.xlu0 %v2194_v49, %s2020_s17  ;;  %v801_v49 = vld [vmem:[#allocation3 + $0x10] sm:$0xff] }
0x12d2   :  { %v710_v57 = vpop.permute.xlu0 %709 }
0x12d3   :  { %v2258_v58 = vmul.f32 %v1941_v48, %v710_v57 }
0x12d5   :  { %v721_v59 = vpack.c.bf16 %v2258_v58, %v2258_v58 }
0x12d6   :  { %v315_v60 = vpop.permute.xlu0 %314 }
0x12d7   :  { %318 = vst.msk [vmem:[#allocation3 + $0x8] sm:$0xff] %vm165_vm2, %v315_v60  ;;  %723 = vrot.lane.b32.xlu1 %v721_v59, %s2020_s17 }
0x12da   :  { %v475_v62 = vpop.permute.xlu0 %474 }
0x12db   :  { %478 = vst.msk [vmem:[#allocation3 + $0x18] sm:$0xff] %vm165_vm2, %v475_v62 }
0x12de   :  { %v800_v6 = vld [vmem:[#allocation3 + $0x8] sm:$0xff] }
0x12df   :  { %v811_v61 = vpack.c.bf16 %v800_v6, %v799_v5 }
0x12e1   :  { %1794 = vmatprep.mubr.msk.bf16.mxu0 %vm165_vm2, %v811_v61 }
0x12e2   :  { %v802_v7 = vld [vmem:[#allocation3 + $0x18] sm:$0xff] }
0x12e3   :  { %v812_v1 = vpack.c.bf16 %v802_v7, %v801_v49 }
0x12e5   :  { %1795 = vmatmul.mubr.msk.bf16.vlgmr.msra.gmra.mrb[20].mxu0 %vm165_vm2, %v812_v1 }
0x12e6   :  { %1819 = vmatpush3.bf16.msra.mxu0 %v2269_v8 }
0x12e7   :  { %1820 = vmatprep.subr.bf16.mxu0 %v2016_v0 }
0x12ea   :  { %1821 = vmatpush3.bf16.msra.mxu0 %v2277_v13 }
0x12eb   :  { %1834 = vmatprep.subr.bf16.mxu0 %v2016_v0 }
0x1349   :  { %v724_v14 = vpop.permute.xlu1 %723 }
0x134a   :  { %1787 = vmatmul.mubr.msk.bf16.vlgmr.msra.gmra.mrb[16].mxu1 %vm165_vm2, %v724_v14 }
0x134b   :  { %1803 = vmatpush3.bf16.msra.mxu1 %v2269_v8  ;;  %1806 = vmatprep.mubr.msk.bf16.mxu1 %vm2017_vm0, %v2016_v0 }
0x134c   :  { %1804 = vmatprep.subr.bf16.mxu1 %v2016_v0 }
0x134f   :  { %1805 = vmatpush3.bf16.msra.mxu1 %v2277_v13 }
0x1350   :  { %1810 = vmatprep.subr.bf16.mxu1 %v2016_v0 }
0x1352   :  { %1807 = vmatmul.mubr.bf16.vlgmr.msra.gmra.mrb[20].mxu1 %v2018_v10  ;;  %v139_v10 = vadd.f32 %v2161_v3, %v2110_v11 }
0x1353   :  { %1811 = vmatpush3.bf16.msra.mxu1 %v2269_v8  ;;  %1814 = vmatprep.mubr.msk.bf16.mxu1 %vm2017_vm0, %v2016_v0 }
0x1354   :  { %1812 = vmatprep.subr.bf16.mxu1 %v2016_v0 }
0x1357   :  { %1813 = vmatpush3.bf16.msra.mxu1 %v2277_v13 }
0x1358   :  { %1826 = vmatprep.subr.bf16.mxu1 %v2016_v0 }
0x13b8   :  { %v2295_v16 = vpop.f32.mrb[20].mxu0 }
0x13b9   :  { %v873_v18 = vpop.f32.mrb[21].mxu0 }
0x13ba   :  { %v2297_v19 = vpop.f32.mrb[22].mxu0  ;;  %v912_v2 = vadd.f32 %v2306_v25, %v873_v18 }
0x13bb   :  { %v2299_v20 = vpop.f32.mrb[23].mxu0 }
0x13bc   :  { %v913_v28 = vadd.f32 %v2306_v25, %v2299_v20 }
0x141d   :  { %v762_v21 = vpop.f32.mrb[16].mxu1 }
0x141e   :  { %v768_v22 = vadd.f32 %v762_v21, %v139_v10  ;;  %v1788_v23 = vpop.f32.mrb[17].mxu1 }
0x141f   :  { %v765_v12 = vpop.f32.mrb[18].mxu1 }
0x1420   :  { %v1789_v24 = vpop.f32.mrb[19].mxu1  ;;  %v1620_v42 = vmul.f32 -1.442695, %v768_v22 }
0x1425   :  { %v980_v26 = vpop.f32.mrb[20].mxu1 }
0x1426   :  { %v986_v27 = vadd.f32 %v980_v26, %v912_v2  ;;  %v1808_v9 = vpop.f32.mrb[21].mxu1 }
0x1427   :  { %v983_v29 = vpop.f32.mrb[22].mxu1 }
0x1428   :  { %1944 = vtanh.f32 %v986_v27  ;;  %v1809_v30 = vpop.f32.mrb[23].mxu1  ;;  %v1635_v11 = vmul.f32 -1.442695, %v986_v27 }
0x142a   :  { %1946 = vpow2.f32 %v1635_v11 }
0x1432   :  { %v1945_v4 = vpop.eup %1944 }
0x1433   :  { %996 = vrot.lane.b32.xlu0 %v1945_v4, %s2019_s16 }
0x1434   :  { %v1947_v3 = vpop.eup %1946 }
0x1435   :  { %v990_v31 = vadd.f32 1.0, %v1947_v3 }
0x1437   :  { %1948 = vrcp.f32 %v990_v31 }
0x1441   :  { %v1949_v32 = vpop.eup %1948 }
0x1442   :  { %v994_v37 = vmul.f32 0.0, %v1949_v32 }
0x14a5   :  { %v997_v33 = vpop.permute.xlu0 %996 }
0x14a6   :  { %v999_v35 = vmul.f32 %v1949_v32, %v997_v33  ;;  %v914_v33 = vadd.f32 %v2295_v16, %v2306_v25 }
0x14a8   :  { %1001 = vrot.lane.b32.xlu1 %v999_v35, %s2020_s17 }
0x151a   :  { %v1002_v38 = vpop.permute.xlu1 %1001 }
0x151b   :  { %v1004_v39 = vadd.f32 %v1002_v38, %v994_v37 }
0x151d   :  { %1950 = vtanh.f32 %v1004_v39 }
0x151e   :  { %1952 = vtanh.f32 %v768_v22 }
0x151f   :  { %1954 = vpow2.f32 %v1620_v42 }
0x1527   :  { %v1951_v40 = vpop.eup %1950 }
0x1528   :  { %1007 = vrot.lane.b32.xlu0 %v1951_v40, %s2019_s16  ;;  %v1953_v41 = vpop.eup %1952 }
0x1529   :  { %v1955_v43 = vpop.eup %1954 }
0x152a   :  { %v772_v44 = vadd.f32 1.0, %v1955_v43 }
0x152c   :  { %778 = vrot.lane.b32.xlu0 %v1953_v41, %s2019_s16  ;;  %1956 = vrcp.f32 %v772_v44 }
0x1536   :  { %v1957_v47 = vpop.eup %1956 }
0x1537   :  { %v776_v63 = vmul.f32 %v1957_v47, %v2241_v53 }
0x159a   :  { %v1008_v15 = vpop.permute.xlu0 %1007 }
0x159b   :  { %v1010_v45 = vmul.f32 %v1949_v32, %v1008_v15 }
0x159d   :  { %v1012_v46 = vpack.c.bf16 %v1010_v45, %v1010_v45 }
0x159e   :  { %v779_v48 = vpop.permute.xlu0 %778 }
0x159f   :  { %v781_v50 = vmul.f32 %v1957_v47, %v779_v48  ;;  %1014 = vrot.lane.b32.xlu1 %v1012_v46, %s2020_s17 }
0x15a1   :  { %783 = vrot.lane.b32.xlu0 %v781_v50, %s2020_s17 }
0x1611   :  { %v1015_v51 = vpop.permute.xlu1 %1014 }
0x1612   :  { %1815 = vmatmul.mubr.msk.bf16.vlgmr.msra.gmra.mrb[24].mxu1 %vm165_vm2, %v1015_v51 }
0x1613   :  { %v784_v52 = vpop.permute.xlu0 %783  ;;  %1827 = vmatpush3.bf16.msra.mxu1 %v2269_v8  ;;  %1830 = vmatprep.mubr.msk.bf16.mxu1 %vm2017_vm0, %v2016_v0 }
0x1614   :  { %v786_v54 = vadd.f32 %v784_v52, %v776_v63  ;;  %1828 = vmatprep.subr.bf16.mxu1 %v2016_v0 }
0x1616   :  { %1958 = vtanh.f32 %v786_v54 }
0x1617   :  { %1829 = vmatpush3.bf16.msra.mxu1 %v2277_v13 }
0x1618   :  { %1842 = vmatprep.subr.bf16.mxu1 %v2016_v0 }
0x1620   :  { %v1959_v55 = vpop.eup %1958 }
0x1621   :  { %789 = vrot.lane.b32.xlu0 %v1959_v55, %s2019_s16  ;;  %v915_v55 = vadd.f32 %v2297_v19, %v2306_v25 }
0x1625   :  { %554 = vrot.lane.b32.xlu0 %v2210_v17, %s2020_s17 }
0x1629   :  { %714 = vrot.lane.b32.xlu0 %v2258_v58, %s2020_s17 }
0x1693   :  { %v790_v53 = vpop.permute.xlu0 %789 }
0x1694   :  { %v792_v21 = vmul.f32 %v1957_v47, %v790_v53 }
0x1697   :  { %v555_v56 = vpop.permute.xlu0 %554 }
0x1698   :  { %558 = vst.msk [vmem:[#allocation3 + $0x20] sm:$0xff] %vm165_vm2, %v555_v56 }
0x169b   :  { %v715_v34 = vpop.permute.xlu0 %714 }
0x169c   :  { %718 = vst.msk [vmem:[#allocation3 + $0x30] sm:$0xff] %vm165_vm2, %v715_v34 }
0x169f   :  { %v803_v26 = vld [vmem:[#allocation3 + $0x20] sm:$0xff] }
0x16e5   :  { %v1053_v57 = vpop.f32.mrb[24].mxu1 }
0x16e6   :  { %v1059_v59 = vadd.f32 %v1053_v57, %v913_v28  ;;  %v1816_v60 = vpop.f32.mrb[25].mxu1 }
0x16e7   :  { %v1056_v62 = vpop.f32.mrb[26].mxu1 }
0x16e8   :  { %1960 = vtanh.f32 %v1059_v59  ;;  %v1817_v5 = vpop.f32.mrb[27].mxu1  ;;  %v1637_v58 = vmul.f32 -1.442695, %v1059_v59 }
0x16ea   :  { %1962 = vpow2.f32 %v1637_v58 }
0x16f2   :  { %v1961_v17 = vpop.eup %1960 }
0x16f3   :  { %1069 = vrot.lane.b32.xlu1 %v1961_v17, %s2019_s16 }
0x16f4   :  { %v1963_v6 = vpop.eup %1962 }
0x16f5   :  { %v1063_v61 = vadd.f32 1.0, %v1963_v6 }
0x16f7   :  { %1964 = vrcp.f32 %v1063_v61 }
0x1701   :  { %v1965_v49 = vpop.eup %1964 }
0x1702   :  { %v1067_v14 = vmul.f32 %v1965_v49, %v1004_v39 }
0x1765   :  { %v1070_v7 = vpop.permute.xlu1 %1069 }
0x1766   :  { %v1072_v1 = vmul.f32 %v1965_v49, %v1070_v7 }
0x1768   :  { %1074 = vrot.lane.b32.xlu1 %v1072_v1, %s2020_s17 }
0x17da   :  { %v1075_v18 = vpop.permute.xlu1 %1074 }
0x17db   :  { %v1077_v20 = vadd.f32 %v1075_v18, %v1067_v14 }
0x17dd   :  { %1966 = vtanh.f32 %v1077_v20 }
0x17e7   :  { %v1967_v10 = vpop.eup %1966 }
0x17e8   :  { %1080 = vrot.lane.b32.xlu1 %v1967_v10, %s2019_s16 }
0x17ec   :  { %634 = vrot.lane.b32.xlu1 %v2227_v36, %s2020_s17  ;;  %v805_v36 = vld [vmem:[#allocation3 + $0x30] sm:$0xff] }
0x17f0   :  { %794 = vrot.lane.b32.xlu1 %v792_v21, %s2020_s17 }
0x185a   :  { %v1081_v22 = vpop.permute.xlu1 %1080 }
0x185b   :  { %v1083_v23 = vmul.f32 %v1965_v49, %v1081_v22 }
0x185d   :  { %v1085_v12 = vpack.c.bf16 %v1083_v23, %v1083_v23 }
0x185e   :  { %v635_v24 = vpop.permute.xlu1 %634 }
0x185f   :  { %638 = vst.msk [vmem:[#allocation3 + $0x28] sm:$0xff] %vm165_vm2, %v635_v24  ;;  %1087 = vrot.lane.b32.xlu0 %v1085_v12, %s2020_s17 }
0x1862   :  { %v795_v2 = vpop.permute.xlu1 %794 }
0x1863   :  { %798 = vst.msk [vmem:[#allocation3 + $0x38] sm:$0xff] %vm165_vm2, %v795_v2 }
0x1866   :  { %v804_v27 = vld [vmem:[#allocation3 + $0x28] sm:$0xff] }
0x1867   :  { %v813_v9 = vpack.c.bf16 %v804_v27, %v803_v26 }
0x1869   :  { %1798 = vmatprep.mubr.msk.bf16.mxu0 %vm165_vm2, %v813_v9 }
0x186a   :  { %v806_v29 = vld [vmem:[#allocation3 + $0x38] sm:$0xff] }
0x186b   :  { %v814_v30 = vpack.c.bf16 %v806_v29, %v805_v36 }
0x186d   :  { %1799 = vmatmul.mubr.msk.bf16.gmra.mrb[24].mxu0 %vm165_vm2, %v814_v30 }
0x186e   :  { %1822 = vmatprep.mubr.msk.bf16.mxu0 %vm2017_vm0, %v2016_v0 }
0x18d1   :  { %v1088_v4 = vpop.permute.xlu0 %1087 }
0x18d2   :  { %1823 = vmatmul.mubr.msk.bf16.vlgmr.msra.gmra.mrb[28].mxu0 %vm165_vm2, %v1088_v4 }
0x18d3   :  { %1835 = vmatpush3.bf16.msra.mxu0 %v2269_v8  ;;  %1838 = vmatprep.mubr.msk.bf16.mxu0 %vm2017_vm0, %v2016_v0 }
0x18d4   :  { %1836 = vmatprep.subr.bf16.mxu0 %v2016_v0 }
0x18d7   :  { %1837 = vmatpush3.bf16.msra.mxu0 %v2277_v13 }
0x18d8   :  { %1850 = vmatprep.subr.bf16.mxu0 %v2016_v0 }
0x1940   :  { %v2352_v11 = vpop.f32.mrb[24].mxu0 }
0x1941   :  { %v2354_v3 = vpop.f32.mrb[25].mxu0 }
0x1942   :  { %v2356_v31 = vpop.f32.mrb[26].mxu0  ;;  %v916_v10 = vadd.f32 %v2306_v25, %v2354_v3 }
0x1943   :  { %v2358_v32 = vpop.f32.mrb[27].mxu0 }
0x19a5   :  { %v1126_v35 = vpop.f32.mrb[28].mxu0 }
0x19a6   :  { %v1132_v37 = vadd.f32 %v1126_v35, %v914_v33  ;;  %v1824_v38 = vpop.f32.mrb[29].mxu0 }
0x19a7   :  { %v1129_v39 = vpop.f32.mrb[30].mxu0 }
0x19a8   :  { %1968 = vtanh.f32 %v1132_v37  ;;  %v1825_v40 = vpop.f32.mrb[31].mxu0  ;;  %v1639_v42 = vmul.f32 -1.442695, %v1132_v37 }
0x19aa   :  { %1970 = vpow2.f32 %v1639_v42 }
0x19b2   :  { %v1969_v41 = vpop.eup %1968 }
0x19b3   :  { %1142 = vrot.lane.b32.xlu1 %v1969_v41, %s2019_s16  ;;  %v917_v41 = vadd.f32 %v2306_v25, %v2358_v32 }
0x19b4   :  { %v1971_v43 = vpop.eup %1970 }
0x19b5   :  { %v1136_v44 = vadd.f32 1.0, %v1971_v43 }
0x19b7   :  { %1972 = vrcp.f32 %v1136_v44 }
0x19c1   :  { %v1973_v15 = vpop.eup %1972 }
0x19c2   :  { %v1140_v16 = vmul.f32 %v1973_v15, %v1077_v20 }
0x1a25   :  { %v1143_v45 = vpop.permute.xlu1 %1142 }
0x1a26   :  { %v1145_v46 = vmul.f32 %v1973_v15, %v1143_v45 }
0x1a28   :  { %1147 = vrot.lane.b32.xlu0 %v1145_v46, %s2020_s17 }
0x1a9a   :  { %v1148_v47 = vpop.permute.xlu0 %1147 }
0x1a9b   :  { %v1150_v48 = vadd.f32 %v1148_v47, %v1140_v16 }
0x1a9d   :  { %1974 = vtanh.f32 %v1150_v48 }
0x1aa7   :  { %v1975_v50 = vpop.eup %1974 }
0x1aa8   :  { %1153 = vrot.lane.b32.xlu1 %v1975_v50, %s2019_s16 }
0x1b1a   :  { %v1154_v51 = vpop.permute.xlu1 %1153 }
0x1b1b   :  { %v1156_v63 = vmul.f32 %v1973_v15, %v1154_v51 }
0x1b1d   :  { %v1158_v52 = vpack.c.bf16 %v1156_v63, %v1156_v63 }
0x1b1f   :  { %1160 = vrot.lane.b32.xlu0 %v1158_v52, %s2020_s17 }
0x1b91   :  { %v1161_v54 = vpop.permute.xlu0 %1160 }
0x1b92   :  { %1831 = vmatmul.mubr.msk.bf16.vlgmr.msra.gmra.mrb[28].mxu1 %vm165_vm2, %v1161_v54 }
0x1b93   :  { %1843 = vmatpush3.bf16.msra.mxu1 %v2269_v8  ;;  %1846 = vmatprep.mubr.msk.bf16.mxu1 %vm2017_vm0, %v2016_v0 }
0x1b94   :  { %1844 = vmatprep.subr.bf16.mxu1 %v2016_v0 }
0x1b97   :  { %1845 = vmatpush3.bf16.msra.mxu1 %v2277_v13 }
0x1b98   :  { %1858 = vmatprep.subr.bf16.mxu1 %v2016_v0 }
0x1c65   :  { %v1199_v53 = vpop.f32.mrb[28].mxu1 }
0x1c66   :  { %v1205_v56 = vadd.f32 %v1199_v53, %v915_v55  ;;  %v1832_v34 = vpop.f32.mrb[29].mxu1 }
0x1c67   :  { %v1202_v28 = vpop.f32.mrb[30].mxu1  ;;  %v918_v34 = vadd.f32 %v2352_v11, %v2306_v25 }
0x1c68   :  { %1976 = vtanh.f32 %v1205_v56  ;;  %v1833_v57 = vpop.f32.mrb[31].mxu1  ;;  %v1641_v60 = vmul.f32 -1.442695, %v1205_v56 }
0x1c6a   :  { %1978 = vpow2.f32 %v1641_v60 }
0x1c72   :  { %v1977_v59 = vpop.eup %1976 }
0x1c73   :  { %1215 = vrot.lane.b32.xlu1 %v1977_v59, %s2019_s16 }
0x1c74   :  { %v1979_v62 = vpop.eup %1978 }
0x1c75   :  { %v1209_v5 = vadd.f32 1.0, %v1979_v62 }
0x1c77   :  { %1980 = vrcp.f32 %v1209_v5 }
0x1c81   :  { %v1981_v17 = vpop.eup %1980 }
0x1c82   :  { %v1213_v19 = vmul.f32 %v1981_v17, %v1150_v48 }
0x1ce5   :  { %v1216_v58 = vpop.permute.xlu1 %1215 }
0x1ce6   :  { %v1218_v6 = vmul.f32 %v1981_v17, %v1216_v58 }
0x1ce8   :  { %1220 = vrot.lane.b32.xlu0 %v1218_v6, %s2020_s17 }
0x1d5a   :  { %v1221_v61 = vpop.permute.xlu0 %1220 }
0x1d5b   :  { %v1223_v49 = vadd.f32 %v1221_v61, %v1213_v19 }
0x1d5d   :  { %1982 = vtanh.f32 %v1223_v49 }
0x1d67   :  { %v1983_v7 = vpop.eup %1982 }
0x1d68   :  { %1226 = vrot.lane.b32.xlu1 %v1983_v7, %s2019_s16 }
0x1dda   :  { %v1227_v1 = vpop.permute.xlu1 %1226 }
0x1ddb   :  { %v1229_v14 = vmul.f32 %v1981_v17, %v1227_v1 }
0x1ddd   :  { %v1231_v18 = vpack.c.bf16 %v1229_v14, %v1229_v14 }
0x1ddf   :  { %1233 = vrot.lane.b32.xlu0 %v1231_v18, %s2020_s17 }
0x1e51   :  { %v1234_v20 = vpop.permute.xlu0 %1233 }
0x1e52   :  { %1839 = vmatmul.mubr.msk.bf16.vlgmr.msra.gmra.mrb[32].mxu0 %vm165_vm2, %v1234_v20 }
0x1e53   :  { %1851 = vmatpush3.bf16.msra.mxu0 %v2269_v8  ;;  %1854 = vmatprep.mubr.msk.bf16.mxu0 %vm2017_vm0, %v2016_v0 }
0x1e54   :  { %1852 = vmatprep.subr.bf16.mxu0 %v2016_v0 }
0x1e57   :  { %1853 = vmatpush3.bf16.msra.mxu0 %v2277_v13 }
0x1e58   :  { %1866 = vmatprep.subr.bf16.mxu0 %v2016_v0 }
0x1f25   :  { %v1272_v21 = vpop.f32.mrb[32].mxu0 }
0x1f26   :  { %v1278_v22 = vadd.f32 %v1272_v21, %v916_v10  ;;  %v1840_v23 = vpop.f32.mrb[33].mxu0 }
0x1f27   :  { %v1275_v12 = vpop.f32.mrb[34].mxu0 }
0x1f28   :  { %1984 = vtanh.f32 %v1278_v22  ;;  %v1841_v24 = vpop.f32.mrb[35].mxu0  ;;  %v1643_v26 = vmul.f32 -1.442695, %v1278_v22  ;;  %v919_v22 = vadd.f32 %v2356_v31, %v2306_v25 }
0x1f2a   :  { %1986 = vpow2.f32 %v1643_v26 }
0x1f32   :  { %v1985_v2 = vpop.eup %1984 }
0x1f33   :  { %1288 = vrot.lane.b32.xlu1 %v1985_v2, %s2019_s16 }
0x1f34   :  { %v1987_v27 = vpop.eup %1986 }
0x1f35   :  { %v1282_v9 = vadd.f32 1.0, %v1987_v27 }
0x1f37   :  { %1988 = vrcp.f32 %v1282_v9 }
0x1f41   :  { %v1989_v36 = vpop.eup %1988 }
0x1f42   :  { %v1286_v4 = vmul.f32 %v1989_v36, %v1223_v49 }
0x1fa5   :  { %v1289_v29 = vpop.permute.xlu1 %1288 }
0x1fa6   :  { %v1291_v30 = vmul.f32 %v1989_v36, %v1289_v29 }
0x1fa8   :  { %1293 = vrot.lane.b32.xlu0 %v1291_v30, %s2020_s17 }
0x201a   :  { %v1294_v3 = vpop.permute.xlu0 %1293 }
0x201b   :  { %v1296_v33 = vadd.f32 %v1294_v3, %v1286_v4 }
0x201d   :  { %1990 = vtanh.f32 %v1296_v33 }
0x2027   :  { %v1991_v35 = vpop.eup %1990 }
0x2028   :  { %1299 = vrot.lane.b32.xlu1 %v1991_v35, %s2019_s16  ;;  %v1886_v35 = vld [vmem:[%s2439_s5] sm:$0xff]  }
0x209a   :  { %v1300_v37 = vpop.permute.xlu1 %1299 }
0x209b   :  { %v1302_v38 = vmul.f32 %v1989_v36, %v1300_v37  ;;  %v1887_v37 = vld [vmem:[%s2439_s5 + $0x8] sm:$0xff]  }
0x209d   :  { %v1304_v39 = vpack.c.bf16 %v1302_v38, %v1302_v38 }
0x209f   :  { %1306 = vrot.lane.b32.xlu0 %v1304_v39, %s2020_s17 }
0x2111   :  { %v1307_v40 = vpop.permute.xlu0 %1306 }
0x2112   :  { %1847 = vmatmul.mubr.msk.bf16.vlgmr.msra.gmra.mrb[32].mxu1 %vm165_vm2, %v1307_v40 }
0x2113   :  { %1859 = vmatpush3.bf16.msra.mxu1 %v2269_v8  ;;  %1862 = vmatprep.mubr.msk.bf16.mxu1 %vm2017_vm0, %v2016_v0 }
0x2114   :  { %1860 = vmatprep.subr.bf16.mxu1 %v2016_v0 }
0x2117   :  { %1861 = vmatpush3.bf16.msra.mxu1 %v2277_v13 }
0x21e5   :  { %v1345_v42 = vpop.f32.mrb[32].mxu1 }
0x21e6   :  { %v1351_v43 = vadd.f32 %v1345_v42, %v917_v41  ;;  %v1848_v44 = vpop.f32.mrb[33].mxu1 }
0x21e7   :  { %v1348_v15 = vpop.f32.mrb[34].mxu1 }
0x21e8   :  { %1992 = vtanh.f32 %v1351_v43  ;;  %v1849_v45 = vpop.f32.mrb[35].mxu1  ;;  %v1645_v8 = vmul.f32 -1.442695, %v1351_v43  ;;  %v1650_v43 = vld [vmem:[%s2440_s6] ss:$0 sm:$0xff] }
0x21ea   :  { %1994 = vpow2.f32 %v1645_v8 }
0x21f2   :  { %v1993_v46 = vpop.eup %1992 }
0x21f3   :  { %1361 = vrot.lane.b32.xlu1 %v1993_v46, %s2019_s16 }
0x21f4   :  { %v1995_v16 = vpop.eup %1994 }
0x21f5   :  { %v1355_v47 = vadd.f32 1.0, %v1995_v16 }
0x21f7   :  { %1996 = vrcp.f32 %v1355_v47 }
0x2201   :  { %v1997_v48 = vpop.eup %1996 }
0x2202   :  { %v1359_v32 = vmul.f32 %v1997_v48, %v1296_v33 }
0x2265   :  { %v1362_v50 = vpop.permute.xlu1 %1361 }
0x2266   :  { %v1364_v13 = vmul.f32 %v1997_v48, %v1362_v50 }
0x2268   :  { %1366 = vrot.lane.b32.xlu0 %v1364_v13, %s2020_s17 }
0x22da   :  { %v1367_v51 = vpop.permute.xlu0 %1366 }
0x22db   :  { %v1369_v63 = vadd.f32 %v1367_v51, %v1359_v32 }
0x22dd   :  { %1998 = vtanh.f32 %v1369_v63 }
0x22e7   :  { %v1999_v52 = vpop.eup %1998 }
0x22e8   :  { %1372 = vrot.lane.b32.xlu1 %v1999_v52, %s2019_s16 }
0x235a   :  { %v1373_v54 = vpop.permute.xlu1 %1372 }
0x235b   :  { %v1375_v55 = vmul.f32 %v1997_v48, %v1373_v54 }
0x235d   :  { %v1377_v53 = vpack.c.bf16 %v1375_v55, %v1375_v55 }
0x235f   :  { %1379 = vrot.lane.b32.xlu0 %v1377_v53, %s2020_s17 }
0x23d1   :  { %v1380_v56 = vpop.permute.xlu0 %1379 }
0x23d2   :  { %1855 = vmatmul.mubr.msk.bf16.vlgmr.msra.gmra.mrb[36].mxu0 %vm165_vm2, %v1380_v56 }
0x23d3   :  { %1870 = vmatprep.mubr.msk.bf16.mxu0 %vm2017_vm0, %v2016_v0  ;;  %1867 = vmatpush3.bf16.msra.mxu0 %v1886_v35 }
0x23d4   :  { %1868 = vmatprep.subr.bf16.mxu0 %v2016_v0 }
0x23d7   :  { %1869 = vmatpush3.bf16.msra.mxu0 %v1887_v37 }
0x24a5   :  { %v1418_v28 = vpop.f32.mrb[36].mxu0 }
0x24a6   :  { %v1424_v57 = vadd.f32 %v1418_v28, %v918_v34  ;;  %v1856_v59 = vpop.f32.mrb[37].mxu0 }
0x24a7   :  { %v1421_v60 = vpop.f32.mrb[38].mxu0 }
0x24a8   :  { %2000 = vtanh.f32 %v1424_v57  ;;  %v1857_v62 = vpop.f32.mrb[39].mxu0  ;;  %v1647_v17 = vmul.f32 -1.442695, %v1424_v57 }
0x24aa   :  { %2002 = vpow2.f32 %v1647_v17 }
0x24b2   :  { %v2001_v5 = vpop.eup %2000 }
0x24b3   :  { %1434 = vrot.lane.b32.xlu1 %v2001_v5, %s2019_s16 }
0x24b4   :  { %v2003_v58 = vpop.eup %2002 }
0x24b5   :  { %v1428_v6 = vadd.f32 1.0, %v2003_v58 }
0x24b7   :  { %2004 = vrcp.f32 %v1428_v6 }
0x24c1   :  { %v2005_v19 = vpop.eup %2004 }
0x24c2   :  { %v1432_v11 = vmul.f32 %v2005_v19, %v1369_v63 }
0x2525   :  { %v1435_v61 = vpop.permute.xlu1 %1434 }
0x2526   :  { %v1437_v49 = vmul.f32 %v2005_v19, %v1435_v61 }
0x2528   :  { %1439 = vrot.lane.b32.xlu0 %v1437_v49, %s2020_s17 }
0x259a   :  { %v1440_v7 = vpop.permute.xlu0 %1439 }
0x259b   :  { %v1442_v1 = vadd.f32 %v1440_v7, %v1432_v11 }
0x259d   :  { %2006 = vtanh.f32 %v1442_v1 }
0x25a7   :  { %v2007_v14 = vpop.eup %2006 }
0x25a8   :  { %1445 = vrot.lane.b32.xlu1 %v2007_v14, %s2019_s16 }
0x261a   :  { %v1446_v18 = vpop.permute.xlu1 %1445 }
0x261b   :  { %v1448_v20 = vmul.f32 %v2005_v19, %v1446_v18 }
0x261d   :  { %v1450_v10 = vpack.c.bf16 %v1448_v20, %v1448_v20 }
0x261f   :  { %1452 = vrot.lane.b32.xlu0 %v1450_v10, %s2020_s17 }
0x2691   :  { %v1453_v21 = vpop.permute.xlu0 %1452 }
0x2692   :  { %1863 = vmatmul.mubr.msk.bf16.vlgmr.msra.gmra.mrb[36].mxu1 %vm165_vm2, %v1453_v21 }
0x2765   :  { %v1491_v23 = vpop.f32.mrb[36].mxu1 }
0x2766   :  { %v1497_v12 = vadd.f32 %v1491_v23, %v919_v22  ;;  %v1864_v24 = vpop.f32.mrb[37].mxu1 }
0x2767   :  { %v1494_v2 = vpop.f32.mrb[38].mxu1 }
0x2768   :  { %2008 = vtanh.f32 %v1497_v12  ;;  %v1865_v26 = vpop.f32.mrb[39].mxu1  ;;  %v1649_v9 = vmul.f32 -1.442695, %v1497_v12 }
0x276a   :  { %2010 = vpow2.f32 %v1649_v9 }
0x2772   :  { %v2009_v27 = vpop.eup %2008 }
0x2773   :  { %1507 = vrot.lane.b32.xlu1 %v2009_v27, %s2019_s16 }
0x2774   :  { %v2011_v36 = vpop.eup %2010 }
0x2775   :  { %v1501_v29 = vadd.f32 1.0, %v2011_v36 }
0x2777   :  { %2012 = vrcp.f32 %v1501_v29 }
0x2781   :  { %v2013_v30 = vpop.eup %2012 }
0x2782   :  { %v1505_v25 = vmul.f32 %v2013_v30, %v1442_v1 }
0x27e5   :  { %v1508_v4 = vpop.permute.xlu1 %1507 }
0x27e6   :  { %v1510_v3 = vmul.f32 %v2013_v30, %v1508_v4 }
0x27e8   :  { %1512 = vrot.lane.b32.xlu0 %v1510_v3, %s2020_s17 }
0x285a   :  { %v1513_v31 = vpop.permute.xlu0 %1512 }
0x285b   :  { %v1515_v33 = vadd.f32 %v1513_v31, %v1505_v25 }
0x285d   :  { %2014 = vtanh.f32 %v1515_v33 }
0x2867   :  { %v2015_v38 = vpop.eup %2014 }
0x2868   :  { %1518 = vrot.lane.b32.xlu1 %v2015_v38, %s2019_s16 }
0x28da   :  { %v1519_v39 = vpop.permute.xlu1 %1518 }
0x28db   :  { %v1521_v40 = vmul.f32 %v2013_v30, %v1519_v39 }
0x28dd   :  { %v1522_v41 = vpack.c.bf16 %v1521_v40, %v1521_v40 }
0x28df   :  { %1535 = vrot.lane.b32.xlu0 %v1522_v41, %s2020_s17 }
0x2951   :  { %v1536_v42 = vpop.permute.xlu0 %1535 }
0x2952   :  { %1871 = vmatmul.mubr.msk.bf16.vlgmr.msra.gmra.mrb[40].mxu0 %vm165_vm2, %v1536_v42 }
0x2a25   :  { %v1586_v44 = vpop.f32.mrb[40].mxu0 }
0x2a26   :  { %v1587_v15 = vadd.f32 %v1650_v43, %v1586_v44  ;;  %v1872_v0 = vpop.f32.mrb[41].mxu0 }
0x2a27   :  { %v1589_v45 = vpop.f32.mrb[42].mxu0 }
0x2a28   :  { %1593 = vst.msk [vmem:[%s2441_s7] sm:$0xff] %vm1592_vm3, %v1587_v15  ;;  %v1873_v46 = vpop.f32.mrb[43].mxu0 }

</bundles_post_ra>
